<compile_context>
chip_gen: v7x
topology: tpu7x:2x2x1
jax: 0.10.0
libtpu: 0.0.40
codegen_flags: <defaults>
</compile_context>

<pallas_src>
import functools

import jax
import jax.numpy as jnp
from jax.experimental import pallas as pl
from jax.experimental.pallas import tpu as pltpu


_LANE = 128     # lane width  (last-dim granularity)
_SUBLANE = 8    # sublane granularity (second-to-last dim)

_ACTS = {
    "ReLU": lambda x: jnp.maximum(x, 0.0),
    "ELU": lambda x: jnp.where(x > 0.0, x, jnp.expm1(x)),
    "Tanh": jnp.tanh,
    "Sigmoid": jax.nn.sigmoid,
    # torch.nn.GELU default is the exact erf form, not the tanh approximation.
    "GELU": lambda x: jax.nn.gelu(x, approximate=False),
}
# TODO(synk): only a subset of torch.nn activations is mapped; extend _ACTS as needed.

_TRANSCENDENTAL_ACTS = ("ELU", "Tanh", "Sigmoid", "GELU")


def _round_up(v, m):
    return (v + m - 1) // m * m


def _cdiv(a, b):
    return -(-a // b)


def _device_kind():
    try:
        return jax.devices()[0].device_kind.lower()
    except Exception:
        return ""


def _vmem_capacity_bytes():
    """Per-TensorCore VMEM capacity, with a device_kind-based fallback."""
    try:
        return int(pltpu.get_tpu_info().vmem_capacity_bytes)
    except Exception:
        kind = _device_kind()
        return (64 << 20) if "v7" in kind else (128 << 20)


def _min_parallel_steps():
    """Minimum number of grid steps on the 'parallel' axis.

    v7x (and megacore v4/v5p) shard the parallel axis across 2 TensorCores, so
    the grid needs >= 2 steps or one core sits idle. v5e/v6e: 1 TC per chip.
    """
    kind = _device_kind()
    if "v7" in kind or "v4" in kind or "v5p" in kind:
        return 2
    return 1


def _choose_row_tiling(M, bytes_per_row, tile_budget_bytes, min_steps,
                       max_tile_rows=2048):
    """Pick (tile_rows, M_pad) with near-minimal row padding.

    Rows are padded only to a multiple of 8 (sublane), then split into
    near-equal tiles; waste is < 8 rows per tile (vs. up to ~2x previously
    when M was rounded up to a full tile).
    """
    M8 = _round_up(max(M, 1), _SUBLANE)
    max_tile = tile_budget_bytes // max(bytes_per_row, 1)
    max_tile = max(_SUBLANE, (max_tile // _SUBLANE) * _SUBLANE)
    max_tile = min(max_tile, max_tile_rows, M8)
    num_tiles = _cdiv(M8, max_tile)
    if M8 >= min_steps * _SUBLANE:
        num_tiles = max(num_tiles, min_steps)
    tile_rows = _round_up(_cdiv(M8, num_tiles), _SUBLANE)
    num_tiles = _cdiv(M8, tile_rows)
    return tile_rows, num_tiles * tile_rows


def _mlp_kernel(*refs, num_layers, redim_layer, act, compute_dtype, precision):
    """Fused multi-layer body.

    refs = (x_ref, [w_pre, b_pre]?, (w_i, b_i) * num_layers, out_ref).
    Weights are compute_dtype, biases f32; matmuls accumulate in f32.
    """
    x_ref = refs[0]
    out_ref = refs[-1]
    params = refs[1:-1]
    act_fn = _ACTS[act]

    # Cast in-kernel (VPU work hidden under the MXU) so the wrapper never has
    # to materialize a converted copy of the input in HBM.
    h = x_ref[...].astype(compute_dtype)
    idx = 0
    if redim_layer:
        w_ref, b_ref = params[0], params[1]
        # pre_mlp_linear has NO activation after it (matches PyTorch code).
        z = jnp.dot(h, w_ref[...], preferred_element_type=jnp.float32,
                    precision=precision) + b_ref[...]
        h = z.astype(compute_dtype)
        idx = 2
    for li in range(num_layers):
        w_ref, b_ref = params[idx], params[idx + 1]
        z = jnp.dot(h, w_ref[...], preferred_element_type=jnp.float32,
                    precision=precision) + b_ref[...]
        z = act_fn(z)
        if li == num_layers - 1:
            # Lane-dense (128-multiple) full-tile store in compute dtype.
            out_ref[...] = z.astype(out_ref.dtype)
        else:
            h = z.astype(compute_dtype)
        idx += 2


def _linear_kernel(x_ref, w_ref, b_ref, o_ref, *, apply_act, act,
                   compute_dtype, precision):
    """Single linear (+ optional activation) layer — weight-streaming fallback."""
    h = x_ref[...].astype(compute_dtype)
    z = jnp.dot(h, w_ref[...], preferred_element_type=jnp.float32,
                precision=precision) + b_ref[...]
    if apply_act:
        z = _ACTS[act](z)
    o_ref[...] = z.astype(o_ref.dtype)


def mlp_forward(x, params, *, num_layers, redim_layer, act,
                compute_dtype=jnp.bfloat16, force_per_layer=False):
    """x: (B, N, F). params: flat list [w_pre, b_pre]? + [w_i, b_i]*num_layers.

    Weights are (in_dim, out_dim) (transpose of PyTorch's (out, in)), biases
    (1, out_dim). Returns (B, N, output_dim) in x.dtype.

    Precision contract: with compute_dtype=bfloat16 hidden activations are
    rounded to bf16 between layers (error compounds with num_layers); with
    compute_dtype=float32 true f32 matmuls (precision=HIGHEST) are used.
    """
    B, N, F = x.shape
    M = B * N
    out_dim = params[-2].shape[1]
    x_bytes = jnp.dtype(x.dtype).itemsize
    cbytes = jnp.dtype(compute_dtype).itemsize
    precision = (jax.lax.Precision.HIGHEST
                 if jnp.dtype(compute_dtype) == jnp.float32 else None)

    # ---- Pad weights/biases so every feature dim is lane-dense (128-multiple)
    # and cast weights to compute_dtype once (biases stay f32 for the accumulate).
    padded_params = []
    layer_dims = []
    for i in range(0, len(params), 2):
        w, b = params[i], params[i + 1]
        kin, kout = w.shape
        kin_p, kout_p = _round_up(kin, _LANE), _round_up(kout, _LANE)
        w_p = jnp.zeros((kin_p, kout_p), compute_dtype)
        w_p = w_p.at[:kin, :kout].set(w.astype(compute_dtype))
        b_p = jnp.zeros((1, kout_p), jnp.float32)
        b_p = b_p.at[:, :kout].set(b.astype(jnp.float32))
        padded_params += [w_p, b_p]
        layer_dims.append((kin_p, kout_p))

    F_pad = layer_dims[0][0]
    out_pad = layer_dims[-1][1]
    assert F_pad == _round_up(F, _LANE)

    weight_bytes = sum(int(p.size) * p.dtype.itemsize for p in padded_params)
    max_feat = max(d for pair in layer_dims for d in pair)

    # ---- Generation-aware VMEM budgets.
    vmem_cap = _vmem_capacity_bytes()
    if vmem_cap >= (128 << 20):
        vmem_target = 100 << 20             # v5e / v6e: 128 MiB per core
    else:
        vmem_target = min(vmem_cap - (20 << 20), 44 << 20)   # v7x: 64 MiB per core
    headroom = 8 << 20
    min_steps = _min_parallel_steps()

    # Per-row VMEM cost of the fused path: double-buffered input tile,
    # double-buffered output tile, plus live f32 z + compute-dtype h.
    fused_row_bytes = (2 * F_pad * x_bytes
                       + 2 * out_pad * cbytes
                       + max_feat * (2 * 4 + cbytes))
    fused_tile_budget = vmem_target - weight_bytes - headroom
    use_fused = (not force_per_layer) and (
        fused_tile_budget >= _SUBLANE * fused_row_bytes)

    if use_fused:
        # ================= Fused path: all weights VMEM-resident ==========
        tile_rows, M_pad = _choose_row_tiling(
            M, fused_row_bytes, fused_tile_budget, min_steps)

        x2 = x.reshape(M, F)
        if M_pad != M or F_pad != F:
            x2 = jnp.pad(x2, ((0, M_pad - M), (0, F_pad - F)))

        grid = (M_pad // tile_rows,)

        in_specs = [pl.BlockSpec((tile_rows, F_pad), lambda i: (i, 0))]
        for p in padded_params:
            # Constant block index + single buffer: resident, no wasted 2nd copy.
            in_specs.append(pl.BlockSpec(p.shape, lambda i: (0, 0),
                                         pipeline_mode=pl.Buffered(1)))
        out_spec = pl.BlockSpec((tile_rows, out_pad), lambda i: (i, 0))

        vmem_needed = (2 * tile_rows * F_pad * x_bytes       # input tiles (x2)
                       + 2 * tile_rows * out_pad * cbytes    # output tiles (x2)
                       + weight_bytes                        # single-buffered weights
                       + tile_rows * max_feat * (2 * 4 + cbytes))  # live z(f32) + h
        vmem_limit = int(min(max(vmem_needed + headroom, 32 << 20),
                             vmem_cap - (4 << 20)))

        flops = 2 * M_pad * sum(kin * kout for kin, kout in layer_dims)
        act_layer_dims = layer_dims[1:] if redim_layer else layer_dims
        transcendentals = 0
        if act in _TRANSCENDENTAL_ACTS:
            transcendentals = M_pad * sum(kout for _, kout in act_layer_dims)
        bytes_accessed = (M_pad * F_pad * x_bytes
                          + weight_bytes
                          + M_pad * out_pad * cbytes)
        cost = pl.CostEstimate(flops=flops, transcendentals=transcendentals,
                               bytes_accessed=bytes_accessed)

        kernel = functools.partial(
            _mlp_kernel, num_layers=num_layers, redim_layer=redim_layer,
            act=act, compute_dtype=compute_dtype, precision=precision)

        out = pl.pallas_call(
            kernel,
            out_shape=jax.ShapeDtypeStruct((M_pad, out_pad), compute_dtype),
            grid_spec=pltpu.PrefetchScalarGridSpec(
                num_scalar_prefetch=0,
                grid=grid,
                in_specs=in_specs,
                out_specs=out_spec,
            ),
            compiler_params=pltpu.CompilerParams(
                dimension_semantics=("parallel",),
                vmem_limit_bytes=vmem_limit,
            ),
            cost_estimate=cost,
        )(x2, *padded_params)
    else:
        # ============ Fallback: stream weights, one pallas_call per layer =====
        # Keeps only ONE layer's weight resident at a time; intermediates live
        # in HBM in compute_dtype. Scales to much larger mlp_dim (esp. v7x).
        # TODO(synk): if a single layer's weight exceeds the VMEM budget, a
        # K/N-streaming grid axis with accumulation would be needed (not done).
        max_w_bytes = max(
            int(padded_params[i].size) * padded_params[i].dtype.itemsize
            for i in range(0, len(padded_params), 2))
        row_bytes = (2 * max_feat * 4          # input tile (f32 worst case), x2
                     + 2 * max_feat * cbytes   # output tile, x2
                     + max_feat * (2 * 4 + cbytes))
        tile_budget = max(vmem_target - max_w_bytes - headroom,
                          _SUBLANE * row_bytes)
        tile_rows, M_pad = _choose_row_tiling(M, row_bytes, tile_budget, min_steps)

        x2 = x.reshape(M, F)
        if M_pad != M or F_pad != F:
            x2 = jnp.pad(x2, ((0, M_pad - M), (0, F_pad - F)))

        vmem_limit = int(min(
            max(max_w_bytes + tile_rows * row_bytes + headroom, 32 << 20),
            vmem_cap - (4 << 20)))

        h = x2
        n_linear = (1 if redim_layer else 0) + num_layers
        for li in range(n_linear):
            w_p, b_p = padded_params[2 * li], padded_params[2 * li + 1]
            apply_act = not (redim_layer and li == 0)
            kin_p, kout_p = w_p.shape
            kernel = functools.partial(
                _linear_kernel, apply_act=apply_act, act=act,
                compute_dtype=compute_dtype, precision=precision)
            h = pl.pallas_call(
                kernel,
                out_shape=jax.ShapeDtypeStruct((M_pad, kout_p), compute_dtype),
                grid_spec=pltpu.PrefetchScalarGridSpec(
                    num_scalar_prefetch=0,
                    grid=(M_pad // tile_rows,),
                    in_specs=[
                        pl.BlockSpec((tile_rows, kin_p), lambda i: (i, 0)),
                        pl.BlockSpec(w_p.shape, lambda i: (0, 0),
                                     pipeline_mode=pl.Buffered(1)),
                        pl.BlockSpec(b_p.shape, lambda i: (0, 0),
                                     pipeline_mode=pl.Buffered(1)),
                    ],
                    out_specs=pl.BlockSpec((tile_rows, kout_p), lambda i: (i, 0)),
                ),
                compiler_params=pltpu.CompilerParams(
                    dimension_semantics=("parallel",),
                    vmem_limit_bytes=vmem_limit,
                ),
            )(h, w_p, b_p)
        out = h

    # Slice off padded rows/lanes; cast back to the input dtype here (free with
    # the slice) so the kernel's HBM write stream stays in compute dtype.
    return out[:M, :out_dim].astype(x.dtype).reshape(B, N, out_dim)


def init_mlp_params(key, *, num_layers, mlp_dim, output_dim, redim_layer):
    """Deterministic PyTorch-style init: U(-1/sqrt(fan_in), 1/sqrt(fan_in))."""
    params = []
    dims = []
    if redim_layer:
        dims.append((output_dim, mlp_dim))
    for _ in range(num_layers - 1):
        dims.append((mlp_dim, mlp_dim))
    dims.append((mlp_dim, output_dim))

    for (fan_in, fan_out) in dims:
        key, kw, kb = jax.random.split(key, 3)
        bound = 1.0 / (fan_in ** 0.5)
        w = jax.random.uniform(kw, (fan_in, fan_out), jnp.float32, -bound, bound)
        b = jax.random.uniform(kb, (1, fan_out), jnp.float32, -bound, bound)
        params += [w, b]
    return params


def mlp_reference(x, params, *, num_layers, redim_layer, act):
    """Plain-JAX (f32) reference mirroring the PyTorch forward."""
    act_fn = _ACTS[act]
    h = x
    idx = 0
    if redim_layer:
        h = h @ params[0] + params[1]
        idx = 2
    for _ in range(num_layers):
        h = h @ params[idx] + params[idx + 1]
        h = act_fn(h)
        idx += 2
    return h


if __name__ == "__main__":
    # Small shapes consistent with the module's forward:
    # expression: (batch_size, num_neighbors, features) with features == output_dim
    # (since redim_layer maps output_dim -> mlp_dim).
    batch, neighbors = 2, 8
    num_layers, mlp_dim, output_dim = 3, 32, 16
    act, redim_layer = "ReLU", True

    key = jax.random.PRNGKey(0)
    kx, kp = jax.random.split(key)
    x = jax.random.normal(kx, (batch, neighbors, output_dim), jnp.float32)

    params = init_mlp_params(
        kp,
        num_layers=num_layers,
        mlp_dim=mlp_dim,
        output_dim=output_dim,
        redim_layer=redim_layer,
    )

    ref = mlp_reference(
        x, params, num_layers=num_layers, redim_layer=redim_layer, act=act
    )

    # f32 compute path (precision=HIGHEST): tight numerical check.
    out_f32 = mlp_forward(
        x, params, num_layers=num_layers, redim_layer=redim_layer, act=act,
        compute_dtype=jnp.float32,
    )
    out_f32 = jax.block_until_ready(out_f32)
    assert out_f32.shape == (batch, neighbors, output_dim), out_f32.shape
    assert jnp.allclose(out_f32, ref, atol=1e-5, rtol=1e-5), "f32 mismatch vs reference"

    # bf16 compute path (default fast path on v6e/v7x): relaxed tolerance.
    out_bf16 = mlp_forward(
        x, params, num_layers=num_layers, redim_layer=redim_layer, act=act,
        compute_dtype=jnp.bfloat16,
    )
    out_bf16 = jax.block_until_ready(out_bf16)
    assert out_bf16.shape == (batch, neighbors, output_dim), out_bf16.shape
    assert jnp.allclose(out_bf16, ref, atol=5e-2, rtol=5e-2), "bf16 mismatch vs reference"

    # Exercise the per-layer weight-streaming fallback path as well.
    out_pl = mlp_forward(
        x, params, num_layers=num_layers, redim_layer=redim_layer, act=act,
        compute_dtype=jnp.float32, force_per_layer=True,
    )
    out_pl = jax.block_until_ready(out_pl)
    assert out_pl.shape == (batch, neighbors, output_dim), out_pl.shape
    assert jnp.allclose(out_pl, ref, atol=1e-5, rtol=1e-5), "per-layer mismatch vs reference"

    print("KERNEL_OK")
</pallas_src>

<mosaic_0001>
module attributes {stable_mosaic.version = 11 : i64} {
  func.func @_mlp_kernel(%arg0: i32, %arg1: memref<16x128xf32, #tpu.memory_space<vmem>>, %arg2: memref<128x128xf32, #tpu.memory_space<vmem>>, %arg3: memref<1x128xf32, #tpu.memory_space<vmem>>, %arg4: memref<128x128xf32, #tpu.memory_space<vmem>>, %arg5: memref<1x128xf32, #tpu.memory_space<vmem>>, %arg6: memref<128x128xf32, #tpu.memory_space<vmem>>, %arg7: memref<1x128xf32, #tpu.memory_space<vmem>>, %arg8: memref<128x128xf32, #tpu.memory_space<vmem>>, %arg9: memref<1x128xf32, #tpu.memory_space<vmem>>, %arg10: memref<16x128xf32, #tpu.memory_space<vmem>>) attributes {dimension_semantics = [#tpu.dimension_semantics<parallel>], iteration_bounds = array<i64: 1>, scalar_prefetch = 0 : i64, scratch_operands = 0 : i64, tpu.core_type = #tpu.core_type<tc>, window_params = [{transform_indices = @transform_0, window_bounds = array<i64: 16, 128>}, {pipeline_mode = #tpu.pipeline_mode<synchronous>, transform_indices = @transform_1, window_bounds = array<i64: 128, 128>}, {pipeline_mode = #tpu.pipeline_mode<synchronous>, transform_indices = @transform_2, window_bounds = array<i64: 1, 128>}, {pipeline_mode = #tpu.pipeline_mode<synchronous>, transform_indices = @transform_3, window_bounds = array<i64: 128, 128>}, {pipeline_mode = #tpu.pipeline_mode<synchronous>, transform_indices = @transform_4, window_bounds = array<i64: 1, 128>}, {pipeline_mode = #tpu.pipeline_mode<synchronous>, transform_indices = @transform_5, window_bounds = array<i64: 128, 128>}, {pipeline_mode = #tpu.pipeline_mode<synchronous>, transform_indices = @transform_6, window_bounds = array<i64: 1, 128>}, {pipeline_mode = #tpu.pipeline_mode<synchronous>, transform_indices = @transform_7, window_bounds = array<i64: 128, 128>}, {pipeline_mode = #tpu.pipeline_mode<synchronous>, transform_indices = @transform_8, window_bounds = array<i64: 1, 128>}, {transform_indices = @transform_9, window_bounds = array<i64: 16, 128>}]} {
    %c0 = arith.constant 0 : index
    %c0_0 = arith.constant 0 : index
    %0 = vector.load %arg1[%c0, %c0_0] : memref<16x128xf32, #tpu.memory_space<vmem>>, vector<16x128xf32>
    %c0_1 = arith.constant 0 : index
    %c0_2 = arith.constant 0 : index
    %1 = vector.load %arg2[%c0_1, %c0_2] : memref<128x128xf32, #tpu.memory_space<vmem>>, vector<128x128xf32>
    %cst = arith.constant dense<0.000000e+00> : vector<16x128xf32>
    %2 = tpu.matmul %0, %1, %cst {dimension_numbers = #tpu.dot_dimension_numbers<[1], [0], [0], [1], [0, 0, 1, 1], [], []>, precision = #tpu.contract_precision<fp32>} : vector<16x128xf32>, vector<128x128xf32>, vector<16x128xf32> -> vector<16x128xf32>
    %c0_3 = arith.constant 0 : index
    %c0_4 = arith.constant 0 : index
    %3 = vector.load %arg3[%c0_3, %c0_4] : memref<1x128xf32, #tpu.memory_space<vmem>>, vector<1x128xf32>
    %4 = vector.broadcast %3 : vector<1x128xf32> to vector<16x128xf32>
    %5 = arith.addf %2, %4 : vector<16x128xf32>
    %c0_5 = arith.constant 0 : index
    %c0_6 = arith.constant 0 : index
    %6 = vector.load %arg4[%c0_5, %c0_6] : memref<128x128xf32, #tpu.memory_space<vmem>>, vector<128x128xf32>
    %cst_7 = arith.constant dense<0.000000e+00> : vector<16x128xf32>
    %7 = tpu.matmul %5, %6, %cst_7 {dimension_numbers = #tpu.dot_dimension_numbers<[1], [0], [0], [1], [0, 0, 1, 1], [], []>, precision = #tpu.contract_precision<fp32>} : vector<16x128xf32>, vector<128x128xf32>, vector<16x128xf32> -> vector<16x128xf32>
    %c0_8 = arith.constant 0 : index
    %c0_9 = arith.constant 0 : index
    %8 = vector.load %arg5[%c0_8, %c0_9] : memref<1x128xf32, #tpu.memory_space<vmem>>, vector<1x128xf32>
    %9 = vector.broadcast %8 : vector<1x128xf32> to vector<16x128xf32>
    %10 = arith.addf %7, %9 : vector<16x128xf32>
    %cst_10 = arith.constant 0.000000e+00 : f32
    %11 = vector.broadcast %cst_10 : f32 to vector<16x128xf32>
    %12 = arith.maximumf %10, %11 : vector<16x128xf32>
    %c0_11 = arith.constant 0 : index
    %c0_12 = arith.constant 0 : index
    %13 = vector.load %arg6[%c0_11, %c0_12] : memref<128x128xf32, #tpu.memory_space<vmem>>, vector<128x128xf32>
    %cst_13 = arith.constant dense<0.000000e+00> : vector<16x128xf32>
    %14 = tpu.matmul %12, %13, %cst_13 {dimension_numbers = #tpu.dot_dimension_numbers<[1], [0], [0], [1], [0, 0, 1, 1], [], []>, precision = #tpu.contract_precision<fp32>} : vector<16x128xf32>, vector<128x128xf32>, vector<16x128xf32> -> vector<16x128xf32>
    %c0_14 = arith.constant 0 : index
    %c0_15 = arith.constant 0 : index
    %15 = vector.load %arg7[%c0_14, %c0_15] : memref<1x128xf32, #tpu.memory_space<vmem>>, vector<1x128xf32>
    %16 = vector.broadcast %15 : vector<1x128xf32> to vector<16x128xf32>
    %17 = arith.addf %14, %16 : vector<16x128xf32>
    %cst_16 = arith.constant 0.000000e+00 : f32
    %18 = vector.broadcast %cst_16 : f32 to vector<16x128xf32>
    %19 = arith.maximumf %17, %18 : vector<16x128xf32>
    %c0_17 = arith.constant 0 : index
    %c0_18 = arith.constant 0 : index
    %20 = vector.load %arg8[%c0_17, %c0_18] : memref<128x128xf32, #tpu.memory_space<vmem>>, vector<128x128xf32>
    %cst_19 = arith.constant dense<0.000000e+00> : vector<16x128xf32>
    %21 = tpu.matmul %19, %20, %cst_19 {dimension_numbers = #tpu.dot_dimension_numbers<[1], [0], [0], [1], [0, 0, 1, 1], [], []>, precision = #tpu.contract_precision<fp32>} : vector<16x128xf32>, vector<128x128xf32>, vector<16x128xf32> -> vector<16x128xf32>
    %c0_20 = arith.constant 0 : index
    %c0_21 = arith.constant 0 : index
    %22 = vector.load %arg9[%c0_20, %c0_21] : memref<1x128xf32, #tpu.memory_space<vmem>>, vector<1x128xf32>
    %23 = vector.broadcast %22 : vector<1x128xf32> to vector<16x128xf32>
    %24 = arith.addf %21, %23 : vector<16x128xf32>
    %cst_22 = arith.constant 0.000000e+00 : f32
    %25 = vector.broadcast %cst_22 : f32 to vector<16x128xf32>
    %26 = arith.maximumf %24, %25 : vector<16x128xf32>
    %c0_23 = arith.constant 0 : index
    %c0_24 = arith.constant 0 : index
    %27 = vector.load %arg10[%c0_23, %c0_24] : memref<16x128xf32, #tpu.memory_space<vmem>>, vector<16x128xf32>
    tpu.vector_store %arg10[%c0_23, %c0_24], %26 {strides = array<i32>} : memref<16x128xf32, #tpu.memory_space<vmem>>, vector<16x128xf32>,
    return
  }
  func.func @transform_0(%arg0: i32) -> (i32, i32) {
    %c0_i32 = arith.constant 0 : i32
    %c0_i32_0 = arith.constant 0 : i32
    return %arg0, %c0_i32 : i32, i32
  }
  func.func @transform_1(%arg0: i32) -> (i32, i32) {
    %c0_i32 = arith.constant 0 : i32
    %c0_i32_0 = arith.constant 0 : i32
    %c0_i32_1 = arith.constant 0 : i32
    return %c0_i32, %c0_i32_0 : i32, i32
  }
  func.func @transform_2(%arg0: i32) -> (i32, i32) {
    %c0_i32 = arith.constant 0 : i32
    %c0_i32_0 = arith.constant 0 : i32
    %c0_i32_1 = arith.constant 0 : i32
    return %c0_i32, %c0_i32_0 : i32, i32
  }
  func.func @transform_3(%arg0: i32) -> (i32, i32) {
    %c0_i32 = arith.constant 0 : i32
    %c0_i32_0 = arith.constant 0 : i32
    %c0_i32_1 = arith.constant 0 : i32
    return %c0_i32, %c0_i32_0 : i32, i32
  }
  func.func @transform_4(%arg0: i32) -> (i32, i32) {
    %c0_i32 = arith.constant 0 : i32
    %c0_i32_0 = arith.constant 0 : i32
    %c0_i32_1 = arith.constant 0 : i32
    return %c0_i32, %c0_i32_0 : i32, i32
  }
  func.func @transform_5(%arg0: i32) -> (i32, i32) {
    %c0_i32 = arith.constant 0 : i32
    %c0_i32_0 = arith.constant 0 : i32
    %c0_i32_1 = arith.constant 0 : i32
    return %c0_i32, %c0_i32_0 : i32, i32
  }
  func.func @transform_6(%arg0: i32) -> (i32, i32) {
    %c0_i32 = arith.constant 0 : i32
    %c0_i32_0 = arith.constant 0 : i32
    %c0_i32_1 = arith.constant 0 : i32
    return %c0_i32, %c0_i32_0 : i32, i32
  }
  func.func @transform_7(%arg0: i32) -> (i32, i32) {
    %c0_i32 = arith.constant 0 : i32
    %c0_i32_0 = arith.constant 0 : i32
    %c0_i32_1 = arith.constant 0 : i32
    return %c0_i32, %c0_i32_0 : i32, i32
  }
  func.func @transform_8(%arg0: i32) -> (i32, i32) {
    %c0_i32 = arith.constant 0 : i32
    %c0_i32_0 = arith.constant 0 : i32
    %c0_i32_1 = arith.constant 0 : i32
    return %c0_i32, %c0_i32_0 : i32, i32
  }
  func.func @transform_9(%arg0: i32) -> (i32, i32) {
    %c0_i32 = arith.constant 0 : i32
    %c0_i32_0 = arith.constant 0 : i32
    return %arg0, %c0_i32 : i32, i32
  }
}

</mosaic_0001>

<bundles_post_ra>
// kernel: tpu_custom_call.1
= control target key start
LH: loop header
LB: loop body
LE: loop exit
PB: predicated region body
PF: predicated region fallthrough
CT: control target
= control target key end

     0   :  { %14 = vsyncpa [#allocation3], 0  ;;  %s6616_s0 = inlined_call_operand.hbm [shape: f32[16,128], index: 0, kind: input, shape index: {}]   ;;  %s6617_s1 = inlined_call_operand.hbm [shape: f32[128,128], index: 1, kind: input, shape index: {}]   ;;  %s6618_s2 = inlined_call_operand.vmem [shape: f32[1,128], index: 2, kind: input, shape index: {}]   ;;  %s6619_s3 = inlined_call_operand.hbm [shape: f32[128,128], index: 3, kind: input, shape index: {}]   ;;  %s6620_s4 = inlined_call_operand.vmem [shape: f32[1,128], index: 4, kind: input, shape index: {}]   ;;  %s6621_s5 = inlined_call_operand.hbm [shape: f32[128,128], index: 5, kind: input, shape index: {}]   ;;  %s6622_s6 = inlined_call_operand.vmem [shape: f32[1,128], index: 6, kind: input, shape index: {}]   ;;  %s6623_s7 = inlined_call_operand.hbm [shape: f32[128,128], index: 7, kind: input, shape index: {}]   ;;  %s6624_s8 = inlined_call_operand.vmem [shape: f32[1,128], index: 8, kind: input, shape index: {}]   ;;  %s6625_s9 = inlined_call_operand.hbm [shape: f32[16,128], index: 9, kind: output, shape index: {}]  }
   0x1   :  { %15 = vsyncpa [#allocation6], 0 }
   0x2   :  { %16 = vsyncpa [#allocation9], 0 }
   0x3   :  { %17 = vsyncpa [#allocation4], 0  ;;  %s5198_s30 = smov [#allocation5]   ;;  %s5199_s11 = smov [#allocation8]  }
   0x4   :  { %s35_s10 = sshll.u32 %s5198_s30, 4  ;;  %s63_s12 = sshll.u32 %s5199_s11, 4  ;;  %s36_s10 = int_to_ptr.vmem [resolvable:$true] %s35_s10  ;;  %s5256_s12 = int_to_ptr.vmem [resolvable:$true] %s63_s12 }
   0x5   :  { %s5058_s15 = scalar_lea.hbm %s6617_s1, 2048 }
   0x6   :  { %p5059_p0 = scmp.ne.s32.totalorder %s6617_s1, %s5058_s15  ;;  %p5062_p1 = scmp.lt.u32.totalorder %s5058_s15, %s6617_s1 }
   0x8   :  { %p5064_p2 = pnand %p5062_p1, %p5059_p0 }
   0xa   :  { %5067 = shalt.err (!%p5064_p2)
}
   0xb   :  { %s5068_s20 = scalar_lea.vmem %s36_s10, 2048  ;;  %p5073_p4 = scmp.lt.s32.totalorder %s36_s10, %s36_s10 }
   0xc   :  { %p5069_p3 = scmp.ne.s32.totalorder %s36_s10, %s5068_s20  ;;  %p5074_p5 = scmp.lt.s32.totalorder %s5068_s20, %s5068_s20 }
   0xe   :  { %p5075_p6 = por %p5074_p5, %p5073_p4 }
  0x10   :  { %p5076_p7 = pnand %p5075_p6, %p5069_p3 }
  0x12   :  { %5079 = shalt.err (!%p5076_p7)
}
  0x13   :  { %s5200_s21 = smov 128   ;;  %s5201_s22 = smov 8  }
  0x14   :  { %41 = dma.hbm_to_vmem [thread:$0]  %s6617_s1, 2048, %s36_s10, [#allocation6], %s5200_s21, %s5200_s21, %s5201_s22  }
  0x15   :  { %s5080_s27 = scalar_lea.hbm %s6621_s5, 2048 }
  0x16   :  { %p5081_p8 = scmp.ne.s32.totalorder %s6621_s5, %s5080_s27  ;;  %p5084_p9 = scmp.lt.u32.totalorder %s5080_s27, %s6621_s5 }
  0x18   :  { %p5086_p10 = pnand %p5084_p9, %p5081_p8 }
  0x1a   :  { %5089 = shalt.err (!%p5086_p10)
}
  0x1b   :  { %s5090_s13 = scalar_lea.vmem %s5256_s12, 2048  ;;  %p5095_p12 = scmp.lt.s32.totalorder %s5256_s12, %s5256_s12 }
  0x1c   :  { %p5091_p11 = scmp.ne.s32.totalorder %s5256_s12, %s5090_s13  ;;  %p5096_p13 = scmp.lt.s32.totalorder %s5090_s13, %s5090_s13 }
  0x1e   :  { %p5097_p0 = por %p5096_p13, %p5095_p12 }
  0x20   :  { %p5098_p1 = pnand %p5097_p0, %p5091_p11 }
  0x22   :  { %5101 = shalt.err (!%p5098_p1)
}
  0x23   :  { %69 = dma.hbm_to_vmem [thread:$0]  %s6621_s5, 2048, %s5256_s12, [#allocation9], %s5200_s21, %s5200_s21, %s5201_s22  }
  0x24   :  { %s5202_s14 = smov [#allocation2]   ;;  %s5203_s16 = smov [#allocation7]  }
  0x25   :  { %s23_s15 = sshll.u32 %s5202_s14, 4  ;;  %s49_s17 = sshll.u32 %s5203_s16, 4  ;;  %s24_s15 = int_to_ptr.vmem [resolvable:$true] %s23_s15  ;;  %s5293_s17 = int_to_ptr.vmem [resolvable:$true] %s49_s17 }
  0x26   :  { %s5102_s20 = scalar_lea.hbm %s6616_s0, 256 }
  0x27   :  { %p5103_p2 = scmp.ne.s32.totalorder %s6616_s0, %s5102_s20  ;;  %p5106_p3 = scmp.lt.u32.totalorder %s5102_s20, %s6616_s0 }
  0x29   :  { %p5108_p4 = pnand %p5106_p3, %p5103_p2 }
  0x2b   :  { %5111 = shalt.err (!%p5108_p4)
}
  0x2c   :  { %s5112_s5 = scalar_lea.vmem %s24_s15, 256  ;;  %p5117_p6 = scmp.lt.s32.totalorder %s24_s15, %s24_s15 }
  0x2d   :  { %p5113_p5 = scmp.ne.s32.totalorder %s24_s15, %s5112_s5  ;;  %p5118_p7 = scmp.lt.s32.totalorder %s5112_s5, %s5112_s5 }
  0x2f   :  { %p5119_p8 = por %p5118_p7, %p5117_p6 }
  0x31   :  { %p5120_p9 = pnand %p5119_p8, %p5113_p5 }
  0x33   :  { %5123 = shalt.err (!%p5120_p9)
}
  0x34   :  { %29 = dma.hbm_to_vmem [thread:$0]  %s6616_s0, 256, %s24_s15, [#allocation3], %s5200_s21, %s5200_s21, %s5201_s22  }
  0x35   :  { %s5124_s30 = scalar_lea.hbm %s6619_s3, 2048 }
  0x36   :  { %p5125_p10 = scmp.ne.s32.totalorder %s6619_s3, %s5124_s30  ;;  %p5128_p11 = scmp.lt.u32.totalorder %s5124_s30, %s6619_s3 }
  0x38   :  { %p5130_p12 = pnand %p5128_p11, %p5125_p10 }
  0x3a   :  { %5133 = shalt.err (!%p5130_p12)
}
  0x3b   :  { %s5134_s14 = scalar_lea.vmem %s5293_s17, 2048  ;;  %p5139_p0 = scmp.lt.s32.totalorder %s5293_s17, %s5293_s17 }
  0x3c   :  { %p5135_p13 = scmp.ne.s32.totalorder %s5293_s17, %s5134_s14  ;;  %p5140_p1 = scmp.lt.s32.totalorder %s5134_s14, %s5134_s14 }
  0x3e   :  { %p5141_p2 = por %p5140_p1, %p5139_p0 }
  0x40   :  { %p5142_p3 = pnand %p5141_p2, %p5135_p13 }
  0x42   :  { %5145 = shalt.err (!%p5142_p3)
}
  0x43   :  { %55 = dma.hbm_to_vmem [thread:$0]  %s6619_s3, 2048, %s5293_s17, [#allocation6], %s5200_s21, %s5200_s21, %s5201_s22  }
  0x44   :  { %s5204_s16 = smov [#allocation10]   ;;  %s5146_s23 = scalar_lea.hbm %s6623_s7, 2048 }
  0x45   :  { %s77_s18 = sshll.u32 %s5204_s16, 4  ;;  %p5147_p4 = scmp.ne.s32.totalorder %s6623_s7, %s5146_s23  ;;  %s78_s18 = int_to_ptr.vmem [resolvable:$true] %s77_s18 }
  0x46   :  { %p5150_p5 = scmp.lt.u32.totalorder %s5146_s23, %s6623_s7 }
  0x48   :  { %p5152_p6 = pnand %p5150_p5, %p5147_p4 }
  0x4a   :  { %5155 = shalt.err (!%p5152_p6)
}
  0x4b   :  { %s5156_s12 = scalar_lea.vmem %s78_s18, 2048  ;;  %p5161_p8 = scmp.lt.s32.totalorder %s78_s18, %s78_s18 }
  0x4c   :  { %p5157_p7 = scmp.ne.s32.totalorder %s78_s18, %s5156_s12  ;;  %p5162_p9 = scmp.lt.s32.totalorder %s5156_s12, %s5156_s12 }
  0x4e   :  { %p5163_p10 = por %p5162_p9, %p5161_p8 }
  0x50   :  { %p5164_p11 = pnand %p5163_p10, %p5157_p7 }
  0x52   :  { %5167 = shalt.err (!%p5164_p11)
}
  0x53   :  { %83 = dma.hbm_to_vmem [thread:$0]  %s6623_s7, 2048, %s78_s18, [#allocation9], %s5200_s21, %s5200_s21, %s5201_s22  }
  0x54   :  { %5190 = dma.done.wait [#allocation3], 256  }
  0x55   :  { %5191 = vsyncadd [#allocation3], 4294967040 }
  0x56   :  { %5192 = dma.done.wait [#allocation6], 4096  }
  0x57   :  { %5193 = vsyncadd [#allocation6], 4294963200 }
  0x58   :  { %5194 = dma.done.wait [#allocation9], 4096  }
  0x59   :  { %5195 = vsyncadd [#allocation9], 4294963200  ;;  %v103_v0 = vld [vmem:[#allocation5] sm:$0xff]  ;;  %v104_v1 = vld [vmem:[#allocation5 + $0x8] sm:$0xff]  ;;  %s5205_s11 = smov [#allocation11]  }
  0x5a   :  { %v105_v2 = vld [vmem:[#allocation5 + $0x10] sm:$0xff]  ;;  %v127_v3 = vand.u32 4294901760, %v103_v0  ;;  %v130_v4 = vand.u32 4294901760, %v104_v1  ;;  %v106_v5 = vld [vmem:[#allocation5 + $0x18] sm:$0xff]  ;;  %v107_v7 = vld [vmem:[#allocation5 + $0x20] sm:$0xff]  ;;  %s2944_s13 = sshll.u32 %s5205_s11, 4  ;;  %s2945_s13 = int_to_ptr.vmem [resolvable:$true] %s2944_s13 }
  0x5b   :  { %v133_v6 = vand.u32 4294901760, %v105_v2  ;;  %v108_v8 = vld [vmem:[#allocation5 + $0x28] sm:$0xff]  ;;  %v136_v9 = vand.u32 4294901760, %v106_v5  ;;  %v139_v11 = vand.u32 4294901760, %v107_v7  ;;  %v5349_v14 = vld [vmem:[#allocation5 + $0x30] sm:$0xff]  ;;  %v5351_v15 = vld [vmem:[#allocation5 + $0x38] sm:$0xff]  ;;  %p5173_p13 = scmp.lt.s32.totalorder %s2945_s13, %s2945_s13 }
  0x5c   :  { %v5345_v10 = vpack.c.bf16 %v130_v4, %v127_v3  ;;  %v142_v12 = vand.u32 4294901760, %v108_v8  ;;  %v101_v16 = vld [vmem:[#allocation2] sm:$0xff]  ;;  %v145_v19 = vand.u32 4294901760, %v5349_v14  ;;  %v148_v20 = vand.u32 4294901760, %v5351_v15  ;;  %v111_v21 = vld [vmem:[#allocation5 + $0x40] sm:$0xff]  ;;  %v112_v22 = vld [vmem:[#allocation5 + $0x48] sm:$0xff] }
  0x5d   :  { %v5347_v13 = vpack.c.bf16 %v136_v9, %v133_v6  ;;  %v5355_v17 = vand.u32 4294901760, %v101_v16  ;;  %v5367_v25 = vsub.f32 %v103_v0, %v127_v3  ;;  %v151_v27 = vand.u32 4294901760, %v111_v21  ;;  %v102_v29 = vld [vmem:[#allocation2 + $0x8] sm:$0xff]  ;;  %v113_v30 = vld [vmem:[#allocation5 + $0x50] sm:$0xff]  ;;  %v115_v33 = vld [vmem:[#allocation5 + $0x60] sm:$0xff]  ;;  %s5168_s1 = scalar_lea.vmem %s2945_s13, 256 }
  0x5e   :  { %4235 = vmatprep.subr.bf16.mxu0 %v5345_v10  ;;  %v5358_v18 = vpack.c.bf16 %v142_v12, %v139_v11  ;;  %v5370_v26 = vpack.c.bf16 %v148_v20, %v145_v19  ;;  %v154_v28 = vand.u32 4294901760, %v112_v22  ;;  %v114_v31 = vld [vmem:[#allocation5 + $0x58] sm:$0xff]  ;;  %v116_v34 = vld [vmem:[#allocation5 + $0x68] sm:$0xff]  ;;  %v117_v35 = vld [vmem:[#allocation5 + $0x70] sm:$0xff]  ;;  %v5375_v36 = vsub.f32 %v104_v1, %v130_v4  ;;  %p5169_p12 = scmp.ne.s32.totalorder %s2945_s13, %s5168_s1  ;;  %p5174_p0 = scmp.lt.s32.totalorder %s5168_s1, %s5168_s1 }
  0x5f   :  { %4237 = vmatpush3.bf16.msra.mxu0 %v5345_v10  ;;  %v5363_v23 = vsub.f32 %v101_v16, %v5355_v17  ;;  %v118_v37 = vld [vmem:[#allocation5 + $0x78] sm:$0xff]  ;;  %v230_v39 = vand.u32 4294901760, %v5367_v25  ;;  %v5379_v40 = vand.u32 4294901760, %v102_v29  ;;  %v5381_v41 = vsub.f32 %v105_v2, %v133_v6 }
  0x60   :  { %4239 = vmatprep.subr.bf16.mxu0 %v5347_v13  ;;  %v5384_v42 = vpack.c.bf16 %v154_v28, %v151_v27  ;;  %v157_v43 = vand.u32 4294901760, %v113_v30  ;;  %v160_v44 = vand.u32 4294901760, %v114_v31  ;;  %v163_v45 = vand.u32 4294901760, %v115_v33  ;;  %p5175_p1 = por %p5174_p0, %p5173_p13 }
  0x61   :  { %v209_v24 = vand.u32 4294901760, %v5363_v23  ;;  %v166_v46 = vand.u32 4294901760, %v116_v34  ;;  %v169_v47 = vand.u32 4294901760, %v117_v35  ;;  %v172_v48 = vand.u32 4294901760, %v118_v37 }
  0x62   :  { %v237_v49 = vand.u32 4294901760, %v5375_v36  ;;  %v5387_v50 = vsub.f32 %v106_v5, %v136_v9  ;;  %v5389_v51 = vsub.f32 %v107_v7, %v139_v11  ;;  %v231_v52 = vsub.f32 %v5367_v25, %v230_v39  ;;  %p5176_p2 = pnand %p5175_p1, %p5169_p12 }
  0x63   :  { %4241 = vmatpush3.bf16.msra.mxu0 %v5347_v13  ;;  %v210_v32 = vsub.f32 %v5363_v23, %v209_v24  ;;  %v5394_v53 = vsub.f32 %v102_v29, %v5379_v40  ;;  %v244_v54 = vand.u32 4294901760, %v5381_v41  ;;  %v5397_v55 = vsub.f32 %v108_v8, %v142_v12 }
  0x64   :  { %4243 = vmatprep.subr.bf16.mxu0 %v5358_v18  ;;  %v5400_v56 = vpack.c.bf16 %v160_v44, %v157_v43  ;;  %v5402_v57 = vpack.c.bf16 %v166_v46, %v163_v45  ;;  %v5404_v58 = vpack.c.bf16 %v172_v48, %v169_v47  ;;  %v238_v59 = vsub.f32 %v5375_v36, %v237_v49 }
  0x65   :  { %v211_v38 = vand.u32 4294901760, %v210_v32  ;;  %v251_v60 = vand.u32 4294901760, %v5387_v50  ;;  %v258_v61 = vand.u32 4294901760, %v5389_v51  ;;  %v232_v62 = vand.u32 4294901760, %v231_v52 }
  0x66   :  { %v219_v63 = vand.u32 4294901760, %v5394_v53  ;;  %v245_v0 = vsub.f32 %v5381_v41, %v244_v54  ;;  %v265_v1 = vand.u32 4294901760, %v5397_v55  ;;  %v5415_v2 = vsub.f32 %v5349_v14, %v145_v19 }
  0x67   :  { %4245 = vmatpush3.bf16.msra.mxu0 %v5358_v18  ;;  %3426 = vmatprep.mubr.f32.mxu0 %v211_v38  ;;  %v5418_v3 = vsub.f32 %v5351_v15, %v148_v20  ;;  %v5420_v4 = vsub.f32 %v111_v21, %v151_v27  ;;  %v5422_v5 = vsub.f32 %v112_v22, %v154_v28  ;;  %v239_v11 = vand.u32 4294901760, %v238_v59 }
  0x68   :  { %4247 = vmatprep.subr.bf16.mxu0 %v5370_v26  ;;  %v5424_v6 = vsub.f32 %v113_v30, %v157_v43  ;;  %v5426_v7 = vsub.f32 %v114_v31, %v160_v44  ;;  %v5428_v8 = vsub.f32 %v115_v33, %v163_v45  ;;  %v5430_v9 = vsub.f32 %v116_v34, %v166_v46 }
  0x69   :  { %v252_v12 = vsub.f32 %v5387_v50, %v251_v60  ;;  %v5433_v14 = vsub.f32 %v117_v35, %v169_v47  ;;  %v5435_v16 = vsub.f32 %v118_v37, %v172_v48  ;;  %v220_v15 = vsub.f32 %v5394_v53, %v219_v63 }
  0x6a   :  { %v246_v19 = vand.u32 4294901760, %v245_v0  ;;  %v259_v20 = vsub.f32 %v5389_v51, %v258_v61  ;;  %v266_v21 = vsub.f32 %v5397_v55, %v265_v1  ;;  %v272_v22 = vand.u32 4294901760, %v5415_v2 }
  0x6b   :  { %4249 = vmatpush3.bf16.msra.mxu0 %v5370_v26  ;;  %v279_v27 = vand.u32 4294901760, %v5418_v3  ;;  %v286_v28 = vand.u32 4294901760, %v5420_v4  ;;  %v293_v29 = vand.u32 4294901760, %v5422_v5  ;;  %v300_v30 = vand.u32 4294901760, %v5424_v6 }
  0x6c   :  { %4251 = vmatprep.subr.bf16.mxu0 %v5384_v42  ;;  %v307_v31 = vand.u32 4294901760, %v5426_v7  ;;  %v314_v32 = vand.u32 4294901760, %v5428_v8  ;;  %v321_v33 = vand.u32 4294901760, %v5430_v9  ;;  %v328_v34 = vand.u32 4294901760, %v5433_v14 }
  0x6d   :  { %v335_v35 = vand.u32 4294901760, %v5435_v16  ;;  %v5454_v37 = vpack.c.bf16 %v237_v49, %v230_v39  ;;  %v5456_v38 = vpack.c.bf16 %v251_v60, %v244_v54  ;;  %v4266_v43 = vpack.c.bf16 %v239_v11, %v232_v62 }
  0x6e   :  { %v5459_v44 = vpack.c.bf16 %v265_v1, %v258_v61  ;;  %v5461_v45 = vpack.c.bf16 %v279_v27, %v272_v22  ;;  %v5463_v46 = vpack.c.bf16 %v293_v29, %v286_v28  ;;  %v253_v47 = vand.u32 4294901760, %v252_v12 }
  0x6f   :  { %4253 = vmatpush3.bf16.msra.mxu0 %v5384_v42  ;;  %v5466_v48 = vpack.c.bf16 %v307_v31, %v300_v30  ;;  %v5468_v52 = vpack.c.bf16 %v321_v33, %v314_v32  ;;  %v5470_v39 = vpack.c.bf16 %v335_v35, %v328_v34  ;;  %v221_v49 = vand.u32 4294901760, %v220_v15 }
  0x70   :  { %4255 = vmatprep.subr.bf16.mxu0 %v5400_v56  ;;  %v260_v54 = vand.u32 4294901760, %v259_v20  ;;  %v267_v59 = vand.u32 4294901760, %v266_v21  ;;  %v4270_v60 = vpack.c.bf16 %v253_v47, %v246_v19  ;;  %v273_v61 = vsub.f32 %v5415_v2, %v272_v22 }
  0x71   :  { %v280_v62 = vsub.f32 %v5418_v3, %v279_v27  ;;  %v287_v12 = vsub.f32 %v5420_v4, %v286_v28  ;;  %v294_v15 = vsub.f32 %v5422_v5, %v293_v29  ;;  %v301_v20 = vsub.f32 %v5424_v6, %v300_v30 }
  0x72   :  { %v4274_v0 = vpack.c.bf16 %v267_v59, %v260_v54  ;;  %v274_v1 = vand.u32 4294901760, %v273_v61  ;;  %v308_v27 = vsub.f32 %v5426_v7, %v307_v31  ;;  %v322_v28 = vsub.f32 %v5430_v9, %v321_v33 }
  0x73   :  { %4257 = vmatpush3.bf16.msra.mxu0 %v5400_v56  ;;  %v281_v11 = vand.u32 4294901760, %v280_v62  ;;  %v288_v21 = vand.u32 4294901760, %v287_v12  ;;  %v295_v22 = vand.u32 4294901760, %v294_v15  ;;  %v336_v61 = vsub.f32 %v5435_v16, %v335_v35  ;;  %v5489_v35 = vld [vmem:[#allocation7] sm:$0xff] }
  0x74   :  { %4259 = vmatprep.subr.bf16.mxu0 %v5402_v57  ;;  %v309_v54 = vand.u32 4294901760, %v308_v27  ;;  %v323_v30 = vand.u32 4294901760, %v322_v28  ;;  %v4298_v33 = vpack.c.bf16 %v5375_v36, %v5367_v25  ;;  %v834_v12 = vand.u32 4294901760, %v5489_v35  ;;  %v5498_v36 = vld [vmem:[#allocation7 + $0x18] sm:$0xff] }
  0x75   :  { %v4278_v19 = vpack.c.bf16 %v281_v11, %v274_v1  ;;  %v4282_v47 = vpack.c.bf16 %v295_v22, %v288_v21  ;;  %v5491_v1 = vld [vmem:[#allocation7 + $0x8] sm:$0xff]  ;;  %v5493_v11 = vld [vmem:[#allocation7 + $0x10] sm:$0xff] }
  0x76   :  { %v837_v25 = vand.u32 4294901760, %v5491_v1  ;;  %v840_v15 = vand.u32 4294901760, %v5493_v11 }
  0x77   :  { %4261 = vmatpush3.bf16.msra.mxu0 %v5402_v57 }
  0x78   :  { %4263 = vmatprep.subr.bf16.mxu0 %v5404_v58  ;;  %v5512_v21 = vpack.c.bf16 %v837_v25, %v834_v12 }
  0x7a   :  { %4427 = vmatprep.subr.bf16.mxu1 %v5512_v21 }
  0x7b   :  { %4265 = vmatpush3.bf16.msra.mxu0 %v5404_v58  ;;  %4429 = vmatpush3.bf16.msra.mxu1 %v5512_v21 }
  0x7c   :  { %4267 = vmatprep.subr.bf16.mxu0 %v4266_v43 }
  0x7e   :  { %3427 = vmatmul.mubr.f32.vlgmr.msra.gmra.mrb[0].mxu0 %v221_v49  ;;  %v302_v49 = vand.u32 4294901760, %v301_v20  ;;  %v4306_v20 = vpack.c.bf16 %v5397_v55, %v5389_v51  ;;  %v5524_v51 = vld [vmem:[#allocation7 + $0x38] sm:$0xff]  ;;  %v4310_v55 = vpack.c.bf16 %v5418_v3, %v5415_v2  ;;  %v4314_v2 = vpack.c.bf16 %v5422_v5, %v5420_v4 }
  0x7f   :  { %4269 = vmatpush3.bf16.msra.mxu0 %v4266_v43  ;;  %3461 = vmatprep.mubr.f32.mxu0 %v5355_v17  ;;  %v315_v43 = vsub.f32 %v5428_v8, %v314_v32  ;;  %v337_v32 = vand.u32 4294901760, %v336_v61  ;;  %v855_v28 = vand.u32 4294901760, %v5524_v51  ;;  %v4318_v61 = vpack.c.bf16 %v5426_v7, %v5424_v6 }
  0x80   :  { %4271 = vmatprep.subr.bf16.mxu0 %v4270_v60  ;;  %v4286_v59 = vpack.c.bf16 %v309_v54, %v302_v49  ;;  %v4322_v5 = vpack.c.bf16 %v5430_v9, %v5428_v8  ;;  %v4326_v6 = vpack.c.bf16 %v5435_v16, %v5433_v14 }
  0x81   :  { %v316_v29 = vand.u32 4294901760, %v315_v43 }
  0x83   :  { %4273 = vmatpush3.bf16.msra.mxu0 %v4270_v60  ;;  %v329_v60 = vsub.f32 %v5433_v14, %v328_v34  ;;  %v4290_v31 = vpack.c.bf16 %v323_v30, %v316_v29  ;;  %v4302_v34 = vpack.c.bf16 %v5387_v50, %v5381_v41  ;;  %v5501_v41 = vld [vmem:[#allocation7 + $0x20] sm:$0xff]  ;;  %v5503_v50 = vld [vmem:[#allocation7 + $0x28] sm:$0xff] }
  0x84   :  { %4275 = vmatprep.subr.bf16.mxu0 %v4274_v0  ;;  %v846_v22 = vand.u32 4294901760, %v5501_v41  ;;  %v849_v27 = vand.u32 4294901760, %v5503_v50  ;;  %v5539_v29 = vld [vmem:[#allocation7 + $0x40] sm:$0xff] }
  0x85   :  { %v330_v62 = vand.u32 4294901760, %v329_v60  ;;  %v858_v30 = vand.u32 4294901760, %v5539_v29 }
  0x86   :  { %v5535_v49 = vpack.c.bf16 %v849_v27, %v846_v22 }
  0x87   :  { %4277 = vmatpush3.bf16.msra.mxu0 %v4274_v0  ;;  %v4294_v0 = vpack.c.bf16 %v337_v32, %v330_v62 }
  0x88   :  { %4279 = vmatprep.subr.bf16.mxu0 %v4278_v19 }
  0x8b   :  { %4281 = vmatpush3.bf16.msra.mxu0 %v4278_v19  ;;  %v843_v19 = vand.u32 4294901760, %v5498_v36 }
  0x8c   :  { %4283 = vmatprep.subr.bf16.mxu0 %v4282_v47 }
  0x8d   :  { %v5520_v43 = vpack.c.bf16 %v843_v19, %v840_v15 }
  0x8f   :  { %4285 = vmatpush3.bf16.msra.mxu0 %v4282_v47  ;;  %v5522_v47 = vld [vmem:[#allocation7 + $0x30] sm:$0xff]  ;;  %4431 = vmatprep.subr.bf16.mxu1 %v5520_v43 }
  0x90   :  { %4287 = vmatprep.subr.bf16.mxu0 %v4286_v59  ;;  %v852_v54 = vand.u32 4294901760, %v5522_v47  ;;  %4433 = vmatpush3.bf16.msra.mxu1 %v5520_v43 }
  0x91   :  { %4435 = vmatprep.subr.bf16.mxu1 %v5535_v49 }
  0x92   :  { %v5551_v3 = vpack.c.bf16 %v855_v28, %v852_v54 }
  0x93   :  { %4289 = vmatpush3.bf16.msra.mxu0 %v4286_v59  ;;  %v5541_v59 = vld [vmem:[#allocation7 + $0x48] sm:$0xff] }
  0x94   :  { %4291 = vmatprep.subr.bf16.mxu0 %v4290_v31  ;;  %v861_v60 = vand.u32 4294901760, %v5541_v59  ;;  %4437 = vmatpush3.bf16.msra.mxu1 %v5535_v49 }
  0x95   :  { %4439 = vmatprep.subr.bf16.mxu1 %v5551_v3 }
  0x96   :  { %v5563_v4 = vpack.c.bf16 %v861_v60, %v858_v30 }
  0x97   :  { %4293 = vmatpush3.bf16.msra.mxu0 %v4290_v31 }
  0x98   :  { %4295 = vmatprep.subr.bf16.mxu0 %v4294_v0  ;;  %4441 = vmatpush3.bf16.msra.mxu1 %v5551_v3 }
  0x99   :  { %4443 = vmatprep.subr.bf16.mxu1 %v5563_v4 }
  0x9b   :  { %4297 = vmatpush3.bf16.msra.mxu0 %v4294_v0 }
  0x9c   :  { %4299 = vmatprep.subr.bf16.mxu0 %v4298_v33  ;;  %4445 = vmatpush3.bf16.msra.mxu1 %v5563_v4 }
  0x9e   :  { %3462 = vmatmul.mubr.f32.vlgmr.msra.gmra.mrb[0].mxu0 %v5379_v40 }
  0x9f   :  { %4301 = vmatpush3.bf16.msra.mxu0 %v4298_v33  ;;  %3496 = vmatprep.mubr.f32.mxu0 %v5363_v23 }
  0xa0   :  { %4303 = vmatprep.subr.bf16.mxu0 %v4302_v34 }
  0xa3   :  { %4305 = vmatpush3.bf16.msra.mxu0 %v4302_v34 }
  0xa4   :  { %4307 = vmatprep.subr.bf16.mxu0 %v4306_v20 }
  0xa7   :  { %4309 = vmatpush3.bf16.msra.mxu0 %v4306_v20 }
  0xa8   :  { %4311 = vmatprep.subr.bf16.mxu0 %v4310_v55 }
  0xab   :  { %4313 = vmatpush3.bf16.msra.mxu0 %v4310_v55 }
  0xac   :  { %4315 = vmatprep.subr.bf16.mxu0 %v4314_v2 }
  0xaf   :  { %4317 = vmatpush3.bf16.msra.mxu0 %v4314_v2 }
  0xb0   :  { %4319 = vmatprep.subr.bf16.mxu0 %v4318_v61 }
  0xb3   :  { %4321 = vmatpush3.bf16.msra.mxu0 %v4318_v61 }
  0xb4   :  { %4323 = vmatprep.subr.bf16.mxu0 %v4322_v5 }
  0xb7   :  { %4325 = vmatpush3.bf16.msra.mxu0 %v4322_v5 }
  0xb8   :  { %4327 = vmatprep.subr.bf16.mxu0 %v4326_v6 }
  0xbb   :  { %4329 = vmatpush3.bf16.msra.mxu0 %v4326_v6 }
  0xbc   :  { %4331 = vmatprep.subr.bf16.mxu0 %v5345_v10 }
  0xbe   :  { %3497 = vmatmul.mubr.f32.vlgmr.msra.gmra.mrb[0].mxu0 %v5394_v53 }
  0xbf   :  { %4333 = vmatpush3.bf16.msra.mxu0 %v5345_v10  ;;  %3531 = vmatprep.mubr.f32.mxu0 %v209_v24  ;;  %v822_v24 = vld [vmem:[#allocation7 + $0x60] sm:$0xff] }
  0xc0   :  { %4335 = vmatprep.subr.bf16.mxu0 %v5347_v13 }
  0xc3   :  { %4337 = vmatpush3.bf16.msra.mxu0 %v5347_v13 }
  0xc4   :  { %4339 = vmatprep.subr.bf16.mxu0 %v5358_v18 }
  0xc7   :  { %4341 = vmatpush3.bf16.msra.mxu0 %v5358_v18 }
  0xc8   :  { %4343 = vmatprep.subr.bf16.mxu0 %v5370_v26 }
  0xcb   :  { %4345 = vmatpush3.bf16.msra.mxu0 %v5370_v26 }
  0xcc   :  { %4347 = vmatprep.subr.bf16.mxu0 %v5384_v42 }
  0xcf   :  { %4349 = vmatpush3.bf16.msra.mxu0 %v5384_v42 }
  0xd0   :  { %4351 = vmatprep.subr.bf16.mxu0 %v5400_v56 }
  0xd3   :  { %4353 = vmatpush3.bf16.msra.mxu0 %v5400_v56 }
  0xd4   :  { %4355 = vmatprep.subr.bf16.mxu0 %v5402_v57 }
  0xd7   :  { %4357 = vmatpush3.bf16.msra.mxu0 %v5402_v57 }
  0xd8   :  { %4359 = vmatprep.subr.bf16.mxu0 %v5404_v58 }
  0xdb   :  { %4361 = vmatpush3.bf16.msra.mxu0 %v5404_v58 }
  0xdc   :  { %4363 = vmatprep.subr.bf16.mxu0 %v5454_v37 }
  0xde   :  { %3532 = vmatmul.mubr.f32.vlgmr.msra.gmra.mrb[0].mxu0 %v219_v63  ;;  %v825_v63 = vld [vmem:[#allocation7 + $0x78] sm:$0xff] }
  0xdf   :  { %4365 = vmatpush3.bf16.msra.mxu0 %v5454_v37  ;;  %3566 = vmatprep.mubr.f32.mxu0 %v5355_v17  ;;  %v879_v8 = vand.u32 4294901760, %v825_v63 }
  0xe0   :  { %4367 = vmatprep.subr.bf16.mxu0 %v5456_v38 }
  0xe1   :  { %v5687_v2 = vsub.f32 %v825_v63, %v879_v8 }
  0xe3   :  { %4369 = vmatpush3.bf16.msra.mxu0 %v5456_v38 }
  0xe4   :  { %4371 = vmatprep.subr.bf16.mxu0 %v5459_v44 }
  0xe7   :  { %4373 = vmatpush3.bf16.msra.mxu0 %v5459_v44 }
  0xe8   :  { %4375 = vmatprep.subr.bf16.mxu0 %v5461_v45 }
  0xeb   :  { %4377 = vmatpush3.bf16.msra.mxu0 %v5461_v45 }
  0xec   :  { %4379 = vmatprep.subr.bf16.mxu0 %v5463_v46 }
  0xef   :  { %4381 = vmatpush3.bf16.msra.mxu0 %v5463_v46 }
  0xf0   :  { %4383 = vmatprep.subr.bf16.mxu0 %v5466_v48 }
  0xf3   :  { %4385 = vmatpush3.bf16.msra.mxu0 %v5466_v48 }
  0xf4   :  { %4387 = vmatprep.subr.bf16.mxu0 %v5468_v52 }
  0xf7   :  { %4389 = vmatpush3.bf16.msra.mxu0 %v5468_v52 }
  0xf8   :  { %4391 = vmatprep.subr.bf16.mxu0 %v5470_v39 }
  0xfb   :  { %4393 = vmatpush3.bf16.msra.mxu0 %v5470_v39 }
  0xfc   :  { %4395 = vmatprep.subr.bf16.mxu0 %v5345_v10 }
  0xfe   :  { %3567 = vmatmul.mubr.f32.vlgmr.msra.gmra.mrb[0].mxu0 %v5379_v40 }
  0xff   :  { %4397 = vmatpush3.bf16.msra.mxu0 %v5345_v10  ;;  %3601 = vmatprep.mubr.f32.mxu0 %v5355_v17  ;;  %v820_v10 = vld [vmem:[#allocation7 + $0x50] sm:$0xff] }
 0x100   :  { %4399 = vmatprep.subr.bf16.mxu0 %v5347_v13  ;;  %v864_v17 = vand.u32 4294901760, %v820_v10 }
 0x102   :  { %v5662_v48 = vsub.f32 %v820_v10, %v864_v17  ;;  %v6626_v10 = vand.u32 4294901760, %v5687_v2 }
 0x103   :  { %4401 = vmatpush3.bf16.msra.mxu0 %v5347_v13  ;;  %v821_v13 = vld [vmem:[#allocation7 + $0x58] sm:$0xff] }
 0x104   :  { %4403 = vmatprep.subr.bf16.mxu0 %v5358_v18  ;;  %v1007_v39 = vand.u32 4294901760, %v5662_v48 }
 0x106   :  { %v1008_v62 = vsub.f32 %v5662_v48, %v1007_v39 }
 0x107   :  { %4405 = vmatpush3.bf16.msra.mxu0 %v5358_v18  ;;  %v867_v18 = vand.u32 4294901760, %v821_v13 }
 0x108   :  { %4407 = vmatprep.subr.bf16.mxu0 %v5370_v26  ;;  %v1009_v34 = vand.u32 4294901760, %v1008_v62 }
 0x109   :  { %v5629_v23 = vpack.c.bf16 %v867_v18, %v864_v17  ;;  %v5664_v52 = vsub.f32 %v821_v13, %v867_v18  ;;  %v1043_v18 = vsub.f32 %v5687_v2, %v6626_v10 }
 0x10b   :  { %4409 = vmatpush3.bf16.msra.mxu0 %v5370_v26  ;;  %v823_v26 = vld [vmem:[#allocation7 + $0x68] sm:$0xff]  ;;  %4447 = vmatprep.subr.bf16.mxu1 %v5629_v23  ;;  %v1014_v31 = vand.u32 4294901760, %v5664_v52  ;;  %v5710_v63 = vpack.c.bf16 %v5664_v52, %v5662_v48 }
 0x10c   :  { %4411 = vmatprep.subr.bf16.mxu0 %v5384_v42  ;;  %v873_v53 = vand.u32 4294901760, %v823_v26  ;;  %4449 = vmatpush3.bf16.msra.mxu1 %v5629_v23 }
 0x10d   :  { %v1015_v32 = vsub.f32 %v5664_v52, %v1014_v31  ;;  %v1530_v52 = vld [vmem:[#allocation8 + $0x58] sm:$0xff] }
 0x10e   :  { %v5676_v33 = vsub.f32 %v823_v26, %v873_v53 }
 0x10f   :  { %4413 = vmatpush3.bf16.msra.mxu0 %v5384_v42  ;;  %v870_v42 = vand.u32 4294901760, %v822_v24 }
 0x110   :  { %4415 = vmatprep.subr.bf16.mxu0 %v5400_v56 }
 0x111   :  { %v5674_v0 = vsub.f32 %v822_v24, %v870_v42 }
 0x113   :  { %4417 = vmatpush3.bf16.msra.mxu0 %v5400_v56  ;;  %v5633_v56 = vpack.c.bf16 %v873_v53, %v870_v42  ;;  %v1044_v42 = vand.u32 4294901760, %v1043_v18 }
 0x114   :  { %4419 = vmatprep.subr.bf16.mxu0 %v5402_v57 }
 0x115   :  { %4451 = vmatprep.subr.bf16.mxu1 %v5633_v56 }
 0x116   :  { %4453 = vmatpush3.bf16.msra.mxu1 %v5633_v56 }
 0x117   :  { %4421 = vmatpush3.bf16.msra.mxu0 %v5402_v57  ;;  %v5643_v57 = vsub.f32 %v5491_v1, %v837_v25  ;;  %v6629_v1 = vand.u32 4294901760, %v5674_v0 }
 0x118   :  { %4423 = vmatprep.subr.bf16.mxu0 %v5404_v58 }
 0x119   :  { %v944_v14 = vand.u32 4294901760, %v5643_v57  ;;  %v1022_v20 = vsub.f32 %v5674_v0, %v6629_v1 }
 0x11b   :  { %4425 = vmatpush3.bf16.msra.mxu0 %v5404_v58  ;;  %v824_v58 = vld [vmem:[#allocation7 + $0x70] sm:$0xff]  ;;  %v945_v38 = vsub.f32 %v5643_v57, %v944_v14  ;;  %v1023_v5 = vand.u32 4294901760, %v1022_v20 }
 0x11c   :  { %v876_v7 = vand.u32 4294901760, %v824_v58 }
 0x11d   :  { %v946_v45 = vand.u32 4294901760, %v945_v38  ;;  %v5728_v38 = vsub.f32 %v5498_v36, %v843_v19 }
 0x11e   :  { %3602 = vmatmul.mubr.f32.vlgmr.msra.gmra.mrb[0].mxu0 %v5379_v40  ;;  %v5638_v40 = vsub.f32 %v5489_v35, %v834_v12  ;;  %v5649_v16 = vpack.c.bf16 %v879_v8, %v876_v7  ;;  %v1016_v35 = vand.u32 4294901760, %v1015_v32  ;;  %v6628_v12 = vand.u32 4294901760, %v5676_v33 }
 0x11f   :  { %v5685_v55 = vsub.f32 %v824_v58, %v876_v7  ;;  %v5714_v7 = vpack.c.bf16 %v5676_v33, %v5674_v0  ;;  %v958_v62 = vand.u32 4294901760, %v5728_v38 }
 0x120   :  { %v937_v9 = vand.u32 4294901760, %v5638_v40  ;;  %4455 = vmatprep.subr.bf16.mxu1 %v5649_v16  ;;  %v5680_v25 = vpack.c.bf16 %v1016_v35, %v1009_v34  ;;  %v1029_v61 = vsub.f32 %v5676_v33, %v6628_v12  ;;  %v5706_v58 = vpack.c.bf16 %v5643_v57, %v5638_v40 }
 0x121   :  { %4457 = vmatpush3.bf16.msra.mxu1 %v5649_v16  ;;  %v6627_v6 = vand.u32 4294901760, %v5685_v55  ;;  %v5718_v8 = vpack.c.bf16 %v5687_v2, %v5685_v55  ;;  %v5738_v34 = vsub.f32 %v5501_v41, %v846_v22 }
 0x122   :  { %v938_v37 = vsub.f32 %v5638_v40, %v937_v9  ;;  %v1030_v13 = vand.u32 4294901760, %v1029_v61  ;;  %v959_v61 = vsub.f32 %v5728_v38, %v958_v62 }
 0x123   :  { %v1036_v17 = vsub.f32 %v5685_v55, %v6627_v6  ;;  %v965_v22 = vand.u32 4294901760, %v5738_v34 }
 0x124   :  { %v939_v44 = vand.u32 4294901760, %v938_v37  ;;  %v5700_v24 = vpack.c.bf16 %v1030_v13, %v1023_v5  ;;  %v5723_v37 = vsub.f32 %v5493_v11, %v840_v15  ;;  %v5743_v11 = vsub.f32 %v5503_v50, %v849_v27 }
 0x125   :  { %v1037_v26 = vand.u32 4294901760, %v1036_v17  ;;  %v5760_v27 = vsub.f32 %v5522_v47, %v852_v54  ;;  %v5768_v13 = vsub.f32 %v5524_v51, %v855_v28  ;;  %v966_v47 = vsub.f32 %v5738_v34, %v965_v22 }
 0x126   :  { %v5659_v46 = vpack.c.bf16 %v946_v45, %v939_v44  ;;  %v2958_v44 = vld [vmem:[%s6618_s2] ss:$0 sm:$0xff]  ;;  %v951_v45 = vand.u32 4294901760, %v5723_v37  ;;  %v972_v50 = vand.u32 4294901760, %v5743_v11 }
 0x127   :  { %v5702_v53 = vpack.c.bf16 %v1044_v42, %v1037_v26  ;;  %v960_v42 = vand.u32 4294901760, %v959_v61  ;;  %v979_v51 = vand.u32 4294901760, %v5760_v27  ;;  %v967_v10 = vand.u32 4294901760, %v966_v47 }
 0x128   :  { %4459 = vmatprep.subr.bf16.mxu1 %v5659_v46  ;;  %v952_v20 = vsub.f32 %v5723_v37, %v951_v45  ;;  %v973_v54 = vsub.f32 %v5743_v11, %v972_v50  ;;  %v4562_v40 = vpack.c.bf16 %v972_v50, %v965_v22  ;;  %v1533_v22 = vld [vmem:[#allocation8 + $0x70] sm:$0xff]  ;;  %v1534_v50 = vld [vmem:[#allocation8 + $0x78] sm:$0xff] }
 0x129   :  { %v980_v12 = vsub.f32 %v5760_v27, %v979_v51 }
 0x12a   :  { %v953_v26 = vand.u32 4294901760, %v952_v20  ;;  %v974_v6 = vand.u32 4294901760, %v973_v54 }
 0x12c   :  { %v4462_v20 = vpack.c.bf16 %v960_v42, %v953_v26  ;;  %v981_v26 = vand.u32 4294901760, %v980_v12  ;;  %v4494_v12 = vpack.c.bf16 %v5728_v38, %v5723_v37  ;;  %v6648_v37 = vand.u32 4294901760, %v5676_v33 }
 0x1f1   :  { %v3603_v32 = vpop.f32.mrb[0].mxu0 }
 0x1f2   :  { %v5002_v36 = vadd.f32 %v3603_v32, %v2958_v44  ;;  %v800_v15 = vpop.f32.mrb[1].mxu0  ;;  %v986_v32 = vand.u32 4294901760, %v5768_v13 }
 0x1f3   :  { %v5003_v19 = vadd.f32 %v2958_v44, %v800_v15  ;;  %v5794_v15 = vsub.f32 %v5541_v59, %v861_v60  ;;  %v4466_v60 = vpack.c.bf16 %v974_v6, %v967_v10  ;;  %v5825_v6 = vld [vmem:[#allocation8] sm:$0xff]  ;;  %v5827_v10 = vld [vmem:[#allocation8 + $0x8] sm:$0xff] }
 0x1f4   :  { %v5745_v35 = vand.u32 4294901760, %v5002_v36  ;;  %v4566_v57 = vpack.c.bf16 %v986_v32, %v979_v51 }
 0x1f5   :  { %v5753_v41 = vand.u32 4294901760, %v5003_v19 }
 0x1f6   :  { %v5763_v5 = vsub.f32 %v5002_v36, %v5745_v35  ;;  %v5789_v36 = vsub.f32 %v5539_v29, %v858_v30  ;;  %v987_v29 = vsub.f32 %v5768_v13, %v986_v32  ;;  %v1000_v30 = vand.u32 4294901760, %v5794_v15 }
 0x1f7   :  { %v5771_v17 = vsub.f32 %v5003_v19, %v5753_v41 }
 0x1f8   :  { %v926_v18 = vand.u32 4294901760, %v5763_v5  ;;  %v993_v59 = vand.u32 4294901760, %v5789_v36  ;;  %v988_v42 = vand.u32 4294901760, %v987_v29  ;;  %v1001_v54 = vsub.f32 %v5794_v15, %v1000_v30  ;;  %v5838_v29 = vld [vmem:[#allocation8 + $0x20] sm:$0xff] }
 0x1f9   :  { %v916_v44 = vand.u32 4294901760, %v5771_v17 }
 0x1fa   :  { %v927_v28 = vsub.f32 %v5763_v5, %v926_v18  ;;  %v994_v47 = vsub.f32 %v5789_v36, %v993_v59 }
 0x1fb   :  { %v917_v19 = vsub.f32 %v5771_v17, %v916_v44 }
 0x1fc   :  { %v928_v1 = vand.u32 4294901760, %v927_v28  ;;  %v4470_v28 = vpack.c.bf16 %v988_v42, %v981_v26  ;;  %v4498_v26 = vpack.c.bf16 %v5743_v11, %v5738_v34 }
 0x1fd   :  { %v918_v61 = vand.u32 4294901760, %v917_v19  ;;  %v1002_v19 = vand.u32 4294901760, %v1001_v54 }
 0x1ff   :  { %3636 = vmatprep.mubr.f32.mxu1 %v918_v61 }
 0x200   :  { %3637 = vmatmul.mubr.f32.vlgmr.msra.gmra.mrb[0].mxu1 %v928_v1  ;;  %v995_v1 = vand.u32 4294901760, %v994_v47  ;;  %v1555_v47 = vand.u32 4294901760, %v5838_v29 }
 0x201   :  { %4461 = vmatpush3.bf16.msra.mxu1 %v5659_v46  ;;  %3671 = vmatprep.mubr.f32.mxu1 %v5753_v41 }
 0x202   :  { %4463 = vmatprep.subr.bf16.mxu1 %v4462_v20  ;;  %v4474_v46 = vpack.c.bf16 %v1002_v19, %v995_v1  ;;  %v5859_v1 = vld [vmem:[#allocation8 + $0x30] sm:$0xff]  ;;  %v5861_v19 = vld [vmem:[#allocation8 + $0x38] sm:$0xff] }
 0x205   :  { %4465 = vmatpush3.bf16.msra.mxu1 %v4462_v20  ;;  %v5835_v20 = vld [vmem:[#allocation8 + $0x18] sm:$0xff] }
 0x206   :  { %4467 = vmatprep.subr.bf16.mxu1 %v4466_v60 }
 0x209   :  { %4469 = vmatpush3.bf16.msra.mxu1 %v4466_v60  ;;  %v5840_v60 = vld [vmem:[#allocation8 + $0x28] sm:$0xff] }
 0x20a   :  { %4471 = vmatprep.subr.bf16.mxu1 %v4470_v28  ;;  %v1558_v54 = vand.u32 4294901760, %v5840_v60 }
 0x20d   :  { %4473 = vmatpush3.bf16.msra.mxu1 %v4470_v28 }
 0x20e   :  { %4475 = vmatprep.subr.bf16.mxu1 %v4474_v46 }
 0x211   :  { %4477 = vmatpush3.bf16.msra.mxu1 %v4474_v46  ;;  %v4502_v46 = vpack.c.bf16 %v5768_v13, %v5760_v27  ;;  %v1585_v27 = vand.u32 4294901760, %v1533_v22 }
 0x212   :  { %4479 = vmatprep.subr.bf16.mxu1 %v5680_v25 }
 0x215   :  { %4481 = vmatpush3.bf16.msra.mxu1 %v5680_v25  ;;  %v5829_v25 = vld [vmem:[#allocation8 + $0x10] sm:$0xff] }
 0x216   :  { %4483 = vmatprep.subr.bf16.mxu1 %v5700_v24  ;;  %v6631_v61 = vand.u32 4294901760, %v5829_v25 }
 0x219   :  { %4485 = vmatpush3.bf16.msra.mxu1 %v5700_v24  ;;  %v6633_v24 = vand.u32 4294901760, %v5825_v6 }
 0x21a   :  { %4487 = vmatprep.subr.bf16.mxu1 %v5702_v53 }
 0x21d   :  { %4489 = vmatpush3.bf16.msra.mxu1 %v5702_v53  ;;  %v6632_v53 = vand.u32 4294901760, %v5827_v10 }
 0x21e   :  { %4491 = vmatprep.subr.bf16.mxu1 %v5706_v58 }
 0x21f   :  { %v5849_v42 = vpack.c.bf16 %v6632_v53, %v6633_v24  ;;  %v4506_v53 = vpack.c.bf16 %v5794_v15, %v5789_v36 }
 0x220   :  { %3672 = vmatmul.mubr.f32.vlgmr.msra.gmra.mrb[0].mxu1 %v5745_v35 }
 0x221   :  { %4493 = vmatpush3.bf16.msra.mxu1 %v5706_v58  ;;  %3706 = vmatprep.mubr.f32.mxu1 %v5771_v17  ;;  %v6630_v58 = vand.u32 4294901760, %v5835_v20 }
 0x222   :  { %4495 = vmatprep.subr.bf16.mxu1 %v4494_v12  ;;  %4619 = vmatprep.subr.bf16.mxu0 %v5849_v42 }
 0x223   :  { %v5857_v28 = vpack.c.bf16 %v6630_v58, %v6631_v61  ;;  %4621 = vmatpush3.bf16.msra.mxu0 %v5849_v42  ;;  %v5872_v58 = vpack.c.bf16 %v1558_v54, %v1555_v47  ;;  %v1561_v61 = vand.u32 4294901760, %v5859_v1 }
 0x225   :  { %4497 = vmatpush3.bf16.msra.mxu1 %v4494_v12  ;;  %4623 = vmatprep.subr.bf16.mxu0 %v5857_v28  ;;  %v1564_v12 = vand.u32 4294901760, %v5861_v19 }
 0x226   :  { %4499 = vmatprep.subr.bf16.mxu1 %v4498_v26 }
 0x227   :  { %4625 = vmatpush3.bf16.msra.mxu0 %v5857_v28  ;;  %v5884_v24 = vpack.c.bf16 %v1564_v12, %v1561_v61 }
 0x228   :  { %4627 = vmatprep.subr.bf16.mxu0 %v5872_v58 }
 0x229   :  { %4501 = vmatpush3.bf16.msra.mxu1 %v4498_v26 }
 0x22a   :  { %4503 = vmatprep.subr.bf16.mxu1 %v4502_v46 }
 0x22b   :  { %4629 = vmatpush3.bf16.msra.mxu0 %v5872_v58 }
 0x22c   :  { %4631 = vmatprep.subr.bf16.mxu0 %v5884_v24 }
 0x22d   :  { %4505 = vmatpush3.bf16.msra.mxu1 %v4502_v46 }
 0x22e   :  { %4507 = vmatprep.subr.bf16.mxu1 %v4506_v53 }
 0x22f   :  { %4633 = vmatpush3.bf16.msra.mxu0 %v5884_v24 }
 0x231   :  { %4509 = vmatpush3.bf16.msra.mxu1 %v4506_v53 }
 0x232   :  { %4511 = vmatprep.subr.bf16.mxu1 %v5710_v63 }
 0x235   :  { %4513 = vmatpush3.bf16.msra.mxu1 %v5710_v63  ;;  %v4554_v63 = vpack.c.bf16 %v944_v14, %v937_v9  ;;  %v4570_v9 = vpack.c.bf16 %v1000_v30, %v993_v59  ;;  %v4574_v14 = vpack.c.bf16 %v1014_v31, %v1007_v39  ;;  %v1576_v39 = vand.u32 4294901760, %v1530_v52  ;;  %v1531_v31 = vld [vmem:[#allocation8 + $0x60] sm:$0xff] }
 0x236   :  { %4515 = vmatprep.subr.bf16.mxu1 %v5714_v7 }
 0x239   :  { %4517 = vmatpush3.bf16.msra.mxu1 %v5714_v7  ;;  %v4558_v7 = vpack.c.bf16 %v958_v62, %v951_v45  ;;  %v6649_v45 = vand.u32 4294901760, %v5685_v55  ;;  %v6650_v62 = vand.u32 4294901760, %v5687_v2  ;;  %v6651_v2 = vand.u32 4294901760, %v5825_v6 }
 0x23a   :  { %4519 = vmatprep.subr.bf16.mxu1 %v5718_v8 }
 0x23b   :  { %v4582_v34 = vpack.c.bf16 %v6650_v62, %v6649_v45  ;;  %v5981_v11 = vsub.f32 %v5825_v6, %v6651_v2 }
 0x23d   :  { %4521 = vmatpush3.bf16.msra.mxu1 %v5718_v8  ;;  %v6647_v8 = vand.u32 4294901760, %v5674_v0  ;;  %v1579_v0 = vand.u32 4294901760, %v1531_v31  ;;  %v1646_v13 = vand.u32 4294901760, %v5981_v11 }
 0x23e   :  { %4523 = vmatprep.subr.bf16.mxu1 %v5512_v21 }
 0x23f   :  { %v4578_v38 = vpack.c.bf16 %v6648_v37, %v6647_v8 }
 0x240   :  { %3707 = vmatmul.mubr.f32.vlgmr.msra.gmra.mrb[0].mxu1 %v5763_v5  ;;  %v1588_v5 = vand.u32 4294901760, %v1534_v50 }
 0x241   :  { %4525 = vmatpush3.bf16.msra.mxu1 %v5512_v21  ;;  %3741 = vmatprep.mubr.f32.mxu1 %v916_v44  ;;  %v1647_v44 = vsub.f32 %v5981_v11, %v1646_v13 }
 0x242   :  { %4527 = vmatprep.subr.bf16.mxu1 %v5520_v43 }
 0x243   :  { %v1648_v32 = vand.u32 4294901760, %v1647_v44 }
 0x245   :  { %4529 = vmatpush3.bf16.msra.mxu1 %v5520_v43 }
 0x246   :  { %4531 = vmatprep.subr.bf16.mxu1 %v5535_v49 }
 0x249   :  { %4533 = vmatpush3.bf16.msra.mxu1 %v5535_v49 }
 0x24a   :  { %4535 = vmatprep.subr.bf16.mxu1 %v5551_v3 }
 0x24d   :  { %4537 = vmatpush3.bf16.msra.mxu1 %v5551_v3 }
 0x24e   :  { %4539 = vmatprep.subr.bf16.mxu1 %v5563_v4 }
 0x251   :  { %4541 = vmatpush3.bf16.msra.mxu1 %v5563_v4 }
 0x252   :  { %4543 = vmatprep.subr.bf16.mxu1 %v5629_v23 }
 0x255   :  { %4545 = vmatpush3.bf16.msra.mxu1 %v5629_v23 }
 0x256   :  { %4547 = vmatprep.subr.bf16.mxu1 %v5633_v56 }
 0x259   :  { %4549 = vmatpush3.bf16.msra.mxu1 %v5633_v56 }
 0x25a   :  { %4551 = vmatprep.subr.bf16.mxu1 %v5649_v16 }
 0x25d   :  { %4553 = vmatpush3.bf16.msra.mxu1 %v5649_v16 }
 0x25e   :  { %4555 = vmatprep.subr.bf16.mxu1 %v4554_v63 }
 0x260   :  { %3742 = vmatmul.mubr.f32.vlgmr.msra.gmra.mrb[0].mxu1 %v926_v18  ;;  %v5992_v18 = vpack.c.bf16 %v1588_v5, %v1585_v27 }
 0x261   :  { %4557 = vmatpush3.bf16.msra.mxu1 %v4554_v63  ;;  %3776 = vmatprep.mubr.f32.mxu1 %v5753_v41  ;;  %v6019_v63 = vsub.f32 %v1530_v52, %v1576_v39  ;;  %v6044_v52 = vsub.f32 %v1534_v50, %v1588_v5 }
 0x262   :  { %4559 = vmatprep.subr.bf16.mxu1 %v4558_v7 }
 0x265   :  { %4561 = vmatpush3.bf16.msra.mxu1 %v4558_v7 }
 0x266   :  { %4563 = vmatprep.subr.bf16.mxu1 %v4562_v40 }
 0x269   :  { %4565 = vmatpush3.bf16.msra.mxu1 %v4562_v40 }
 0x26a   :  { %4567 = vmatprep.subr.bf16.mxu1 %v4566_v57 }
 0x26d   :  { %4569 = vmatpush3.bf16.msra.mxu1 %v4566_v57 }
 0x26e   :  { %4571 = vmatprep.subr.bf16.mxu1 %v4570_v9 }
 0x271   :  { %4573 = vmatpush3.bf16.msra.mxu1 %v4570_v9  ;;  %v6638_v9 = vand.u32 4294901760, %v6019_v63 }
 0x272   :  { %4575 = vmatprep.subr.bf16.mxu1 %v4574_v14 }
 0x273   :  { %v1724_v37 = vsub.f32 %v6019_v63, %v6638_v9 }
 0x275   :  { %4577 = vmatpush3.bf16.msra.mxu1 %v4574_v14 }
 0x276   :  { %4579 = vmatprep.subr.bf16.mxu1 %v4578_v38 }
 0x279   :  { %4581 = vmatpush3.bf16.msra.mxu1 %v4578_v38  ;;  %v6031_v38 = vsub.f32 %v1531_v31, %v1579_v0 }
 0x27a   :  { %4583 = vmatprep.subr.bf16.mxu1 %v4582_v34 }
 0x27d   :  { %4585 = vmatpush3.bf16.msra.mxu1 %v4582_v34  ;;  %v1725_v34 = vand.u32 4294901760, %v1724_v37 }
 0x27e   :  { %4587 = vmatprep.subr.bf16.mxu1 %v5512_v21 }
 0x280   :  { %3777 = vmatmul.mubr.f32.vlgmr.msra.gmra.mrb[0].mxu1 %v5745_v35 }
 0x281   :  { %4589 = vmatpush3.bf16.msra.mxu1 %v5512_v21  ;;  %3811 = vmatprep.mubr.f32.mxu1 %v5753_v41  ;;  %v1527_v21 = vld [vmem:[#allocation8 + $0x40] sm:$0xff] }
 0x282   :  { %4591 = vmatprep.subr.bf16.mxu1 %v5520_v43 }
 0x285   :  { %4593 = vmatpush3.bf16.msra.mxu1 %v5520_v43  ;;  %v1528_v43 = vld [vmem:[#allocation8 + $0x48] sm:$0xff] }
 0x286   :  { %4595 = vmatprep.subr.bf16.mxu1 %v5535_v49 }
 0x289   :  { %4597 = vmatpush3.bf16.msra.mxu1 %v5535_v49  ;;  %v1567_v49 = vand.u32 4294901760, %v1527_v21 }
 0x28a   :  { %4599 = vmatprep.subr.bf16.mxu1 %v5551_v3 }
 0x28b   :  { %v6005_v59 = vsub.f32 %v1527_v21, %v1567_v49  ;;  %v6637_v21 = vand.u32 4294901760, %v6031_v38 }
 0x28d   :  { %4601 = vmatpush3.bf16.msra.mxu1 %v5551_v3  ;;  %v1570_v3 = vand.u32 4294901760, %v1528_v43  ;;  %v1702_v6 = vand.u32 4294901760, %v6005_v59 }
 0x28e   :  { %4603 = vmatprep.subr.bf16.mxu1 %v5563_v4 }
 0x28f   :  { %v5968_v48 = vpack.c.bf16 %v1570_v3, %v1567_v49  ;;  %v6007_v30 = vsub.f32 %v1528_v43, %v1570_v3  ;;  %v1703_v53 = vsub.f32 %v6005_v59, %v1702_v6  ;;  %v1731_v3 = vsub.f32 %v6031_v38, %v6637_v21 }
 0x291   :  { %4605 = vmatpush3.bf16.msra.mxu1 %v5563_v4  ;;  %v1529_v4 = vld [vmem:[#allocation8 + $0x50] sm:$0xff]  ;;  %4635 = vmatprep.subr.bf16.mxu0 %v5968_v48  ;;  %v1704_v7 = vand.u32 4294901760, %v1703_v53  ;;  %v6067_v44 = vpack.c.bf16 %v6007_v30, %v6005_v59 }
 0x292   :  { %4607 = vmatprep.subr.bf16.mxu1 %v5629_v23  ;;  %4637 = vmatpush3.bf16.msra.mxu0 %v5968_v48  ;;  %v2959_v53 = vld [vmem:[%s6620_s4] ss:$0 sm:$0xff] }
 0x295   :  { %4609 = vmatpush3.bf16.msra.mxu1 %v5629_v23  ;;  %v1573_v23 = vand.u32 4294901760, %v1529_v4 }
 0x296   :  { %4611 = vmatprep.subr.bf16.mxu1 %v5633_v56 }
 0x297   :  { %v6017_v46 = vsub.f32 %v1529_v4, %v1573_v23  ;;  %v6042_v4 = vsub.f32 %v1533_v22, %v1585_v27 }
 0x299   :  { %4613 = vmatpush3.bf16.msra.mxu1 %v5633_v56  ;;  %v5972_v56 = vpack.c.bf16 %v1576_v39, %v1573_v23  ;;  %v1716_v57 = vand.u32 4294901760, %v6017_v46  ;;  %v1732_v39 = vand.u32 4294901760, %v1731_v3  ;;  %v6635_v31 = vand.u32 4294901760, %v6042_v4 }
 0x29a   :  { %4615 = vmatprep.subr.bf16.mxu1 %v5649_v16  ;;  %v6658_v59 = vand.u32 4294901760, %v6042_v4 }
 0x29b   :  { %4639 = vmatprep.subr.bf16.mxu0 %v5972_v56  ;;  %v1717_v8 = vsub.f32 %v6017_v46, %v1716_v57 }
 0x29c   :  { %4641 = vmatpush3.bf16.msra.mxu0 %v5972_v56 }
 0x29d   :  { %4617 = vmatpush3.bf16.msra.mxu1 %v5649_v16  ;;  %v1532_v16 = vld [vmem:[#allocation8 + $0x68] sm:$0xff]  ;;  %v1718_v62 = vand.u32 4294901760, %v1717_v8 }
 0x29e   :  { %v1582_v33 = vand.u32 4294901760, %v1532_v16 }
 0x29f   :  { %v6037_v49 = vpack.c.bf16 %v1725_v34, %v1718_v62 }
 0x2a0   :  { %3812 = vmatmul.mubr.f32.vlgmr.msra.gmra.mrb[0].mxu1 %v5745_v35  ;;  %v5976_v55 = vpack.c.bf16 %v1582_v33, %v1579_v0  ;;  %v6652_v35 = vand.u32 4294901760, %v5827_v10  ;;  %v6033_v45 = vsub.f32 %v1532_v16, %v1582_v33  ;;  %v6634_v16 = vand.u32 4294901760, %v6044_v52 }
 0x2a1   :  { %v1745_v33 = vsub.f32 %v6042_v4, %v6635_v31 }
 0x2a2   :  { %v5986_v41 = vsub.f32 %v5827_v10, %v6652_v35  ;;  %4643 = vmatprep.subr.bf16.mxu0 %v5976_v55  ;;  %v1709_v10 = vand.u32 4294901760, %v6007_v30  ;;  %v6636_v43 = vand.u32 4294901760, %v6033_v45  ;;  %v1752_v2 = vsub.f32 %v6044_v52, %v6634_v16 }
 0x2a3   :  { %4645 = vmatpush3.bf16.msra.mxu0 %v5976_v55  ;;  %v1746_v22 = vand.u32 4294901760, %v1745_v33  ;;  %v6104_v33 = vsub.f32 %v5840_v60, %v1558_v54  ;;  %v6124_v54 = vsub.f32 %v5859_v1, %v1561_v61 }
 0x2a4   :  { %v1653_v17 = vand.u32 4294901760, %v5986_v41  ;;  %4647 = vmatprep.subr.bf16.mxu0 %v5992_v18  ;;  %v1710_v26 = vsub.f32 %v6007_v30, %v1709_v10  ;;  %v1738_v23 = vsub.f32 %v6033_v45, %v6636_v43  ;;  %v1753_v50 = vand.u32 4294901760, %v1752_v2 }
 0x2a5   :  { %v6063_v5 = vpack.c.bf16 %v5986_v41, %v5981_v11  ;;  %v1681_v60 = vand.u32 4294901760, %v6104_v33  ;;  %v6659_v30 = vand.u32 4294901760, %v6044_v52 }
 0x2a6   :  { %v1654_v51 = vsub.f32 %v5986_v41, %v1653_v17  ;;  %v1711_v40 = vand.u32 4294901760, %v1710_v26  ;;  %v1739_v0 = vand.u32 4294901760, %v1738_v23  ;;  %v6059_v27 = vpack.c.bf16 %v1753_v50, %v1746_v22 }
 0x2a7   :  { %4649 = vmatpush3.bf16.msra.mxu0 %v5992_v18  ;;  %v6653_v26 = vand.u32 4294901760, %v5829_v25  ;;  %v1682_v1 = vsub.f32 %v6104_v33, %v1681_v60 }
 0x2a8   :  { %v1655_v36 = vand.u32 4294901760, %v1654_v51  ;;  %v6023_v14 = vpack.c.bf16 %v1711_v40, %v1704_v7  ;;  %v6057_v35 = vpack.c.bf16 %v1739_v0, %v1732_v39  ;;  %v6071_v51 = vpack.c.bf16 %v6019_v63, %v6017_v46  ;;  %v2239_v46 = vld [vmem:[#allocation10 + $0x58] sm:$0xff] }
 0x2a9   :  { %v6087_v7 = vsub.f32 %v5829_v25, %v6653_v26  ;;  %v6654_v40 = vand.u32 4294901760, %v5835_v20  ;;  %v6099_v0 = vsub.f32 %v5838_v29, %v1555_v47  ;;  %v6129_v26 = vsub.f32 %v5861_v19, %v1564_v12 }
 0x2aa   :  { %v6002_v15 = vpack.c.bf16 %v1655_v36, %v1648_v32  ;;  %v6075_v32 = vpack.c.bf16 %v6033_v45, %v6031_v38  ;;  %v6079_v36 = vpack.c.bf16 %v6044_v52, %v6042_v4  ;;  %v1688_v19 = vand.u32 4294901760, %v6124_v54 }
 0x2ab   :  { %v6092_v8 = vsub.f32 %v5835_v20, %v6654_v40  ;;  %v1660_v23 = vand.u32 4294901760, %v6087_v7  ;;  %v1674_v47 = vand.u32 4294901760, %v6099_v0  ;;  %v1695_v12 = vand.u32 4294901760, %v6129_v26 }
 0x2ac   :  { %4651 = vmatprep.subr.bf16.mxu0 %v6002_v15  ;;  %v1683_v43 = vand.u32 4294901760, %v1682_v1  ;;  %v1689_v21 = vsub.f32 %v6124_v54, %v1688_v19 }
 0x2ad   :  { %v1667_v39 = vand.u32 4294901760, %v6092_v8  ;;  %v1661_v50 = vsub.f32 %v6087_v7, %v1660_v23  ;;  %v1696_v9 = vsub.f32 %v6129_v26, %v1695_v12  ;;  %v4754_v11 = vpack.c.bf16 %v1681_v60, %v1674_v47 }
 0x2ae   :  { %v4758_v41 = vpack.c.bf16 %v1695_v12, %v1688_v19 }
 0x2af   :  { %v1668_v29 = vsub.f32 %v6092_v8, %v1667_v39 }
 0x373   :  { %v3813_v37 = vpop.f32.mrb[0].mxu1 }
 0x374   :  { %v5004_v62 = vadd.f32 %v3813_v37, %v2959_v53  ;;  %v1507_v34 = vpop.f32.mrb[1].mxu1 }
 0x375   :  { %v5005_v3 = vadd.f32 %v2959_v53, %v1507_v34  ;;  %v1662_v34 = vand.u32 4294901760, %v1661_v50 }
 0x376   :  { %v1518_v25 = vmax.f32 %v5004_v62, 0.0 }
 0x377   :  { %v1517_v20 = vmax.f32 %v5005_v3, 0.0  ;;  %v1669_v3 = vand.u32 4294901760, %v1668_v29 }
 0x378   :  { %v6106_v2 = vand.u32 4294901760, %v1518_v25 }
 0x379   :  { %v6108_v22 = vand.u32 4294901760, %v1517_v20  ;;  %v4654_v29 = vpack.c.bf16 %v1669_v3, %v1662_v34  ;;  %v1690_v34 = vand.u32 4294901760, %v1689_v21  ;;  %v1697_v3 = vand.u32 4294901760, %v1696_v9  ;;  %v6170_v9 = vld [vmem:[#allocation10] sm:$0xff]  ;;  %v6174_v21 = vld [vmem:[#allocation10 + $0x10] sm:$0xff] }
 0x37a   :  { %v6118_v53 = vsub.f32 %v1518_v25, %v6106_v2  ;;  %v1675_v25 = vsub.f32 %v6099_v0, %v1674_v47 }
 0x37b   :  { %v6132_v40 = vsub.f32 %v1517_v20, %v6108_v22 }
 0x37c   :  { %v1635_v37 = vand.u32 4294901760, %v6118_v53  ;;  %v1676_v16 = vand.u32 4294901760, %v1675_v25  ;;  %v4662_v25 = vpack.c.bf16 %v1697_v3, %v1690_v34  ;;  %v6204_v34 = vld [vmem:[#allocation10 + $0x30] sm:$0xff]  ;;  %v6206_v3 = vld [vmem:[#allocation10 + $0x38] sm:$0xff] }
 0x37d   :  { %v1625_v62 = vand.u32 4294901760, %v6132_v40 }
 0x37e   :  { %v1636_v61 = vsub.f32 %v6118_v53, %v1635_v37 }
 0x37f   :  { %v1626_v20 = vsub.f32 %v6132_v40, %v1625_v62 }
 0x380   :  { %v1637_v31 = vand.u32 4294901760, %v1636_v61  ;;  %v4690_v61 = vpack.c.bf16 %v6104_v33, %v6099_v0  ;;  %v2242_v0 = vld [vmem:[#allocation10 + $0x70] sm:$0xff]  ;;  %v2243_v33 = vld [vmem:[#allocation10 + $0x78] sm:$0xff] }
 0x381   :  { %v1627_v50 = vand.u32 4294901760, %v1626_v20  ;;  %v4658_v20 = vpack.c.bf16 %v1683_v43, %v1676_v16  ;;  %v2252_v43 = vand.u32 4294901760, %v6170_v9  ;;  %v6640_v16 = vand.u32 4294901760, %v6174_v21 }
 0x383   :  { %3846 = vmatprep.mubr.f32.mxu0 %v1627_v50  ;;  %v6326_v52 = vsub.f32 %v6170_v9, %v2252_v43 }
 0x384   :  { %3847 = vmatmul.mubr.f32.vlgmr.msra.gmra.mrb[2].mxu0 %v1637_v31  ;;  %v6180_v31 = vld [vmem:[#allocation10 + $0x18] sm:$0xff] }
 0x385   :  { %4653 = vmatpush3.bf16.msra.mxu0 %v6002_v15  ;;  %3881 = vmatprep.mubr.f32.mxu0 %v6108_v22  ;;  %v4686_v15 = vpack.c.bf16 %v6092_v8, %v6087_v7  ;;  %v6657_v7 = vand.u32 4294901760, %v6033_v45  ;;  %v2355_v47 = vand.u32 4294901760, %v6326_v52 }
 0x386   :  { %4655 = vmatprep.subr.bf16.mxu0 %v4654_v29 }
 0x389   :  { %4657 = vmatpush3.bf16.msra.mxu0 %v4654_v29 }
 0x38a   :  { %4659 = vmatprep.subr.bf16.mxu0 %v4658_v20 }
 0x38d   :  { %4661 = vmatpush3.bf16.msra.mxu0 %v4658_v20 }
 0x38e   :  { %4663 = vmatprep.subr.bf16.mxu0 %v4662_v25 }
 0x391   :  { %4665 = vmatpush3.bf16.msra.mxu0 %v4662_v25  ;;  %v4694_v25 = vpack.c.bf16 %v6129_v26, %v6124_v54  ;;  %v2356_v54 = vsub.f32 %v6326_v52, %v2355_v47 }
 0x392   :  { %4667 = vmatprep.subr.bf16.mxu0 %v6023_v14 }
 0x395   :  { %4669 = vmatpush3.bf16.msra.mxu0 %v6023_v14  ;;  %v6172_v14 = vld [vmem:[#allocation10 + $0x8] sm:$0xff] }
 0x396   :  { %4671 = vmatprep.subr.bf16.mxu0 %v6037_v49 }
 0x399   :  { %4673 = vmatpush3.bf16.msra.mxu0 %v6037_v49  ;;  %v6641_v49 = vand.u32 4294901760, %v6172_v14 }
 0x39a   :  { %4675 = vmatprep.subr.bf16.mxu0 %v6057_v35 }
 0x39b   :  { %v6194_v1 = vpack.c.bf16 %v6641_v49, %v2252_v43 }
 0x39d   :  { %4677 = vmatpush3.bf16.msra.mxu0 %v6057_v35  ;;  %v6183_v35 = vld [vmem:[#allocation10 + $0x20] sm:$0xff]  ;;  %4811 = vmatprep.subr.bf16.mxu1 %v6194_v1 }
 0x39e   :  { %4679 = vmatprep.subr.bf16.mxu0 %v6059_v27  ;;  %v2264_v50 = vand.u32 4294901760, %v6183_v35  ;;  %4813 = vmatpush3.bf16.msra.mxu1 %v6194_v1 }
 0x3a1   :  { %4681 = vmatpush3.bf16.msra.mxu0 %v6059_v27  ;;  %v6185_v27 = vld [vmem:[#allocation10 + $0x28] sm:$0xff] }
 0x3a2   :  { %4683 = vmatprep.subr.bf16.mxu0 %v6063_v5  ;;  %v2267_v29 = vand.u32 4294901760, %v6185_v27 }
 0x3a4   :  { %3882 = vmatmul.mubr.f32.vlgmr.msra.gmra.mrb[2].mxu0 %v6106_v2 }
 0x3a5   :  { %4685 = vmatpush3.bf16.msra.mxu0 %v6063_v5  ;;  %3916 = vmatprep.mubr.f32.mxu0 %v6132_v40  ;;  %v6639_v5 = vand.u32 4294901760, %v6180_v31  ;;  %v2357_v40 = vand.u32 4294901760, %v2356_v54 }
 0x3a6   :  { %4687 = vmatprep.subr.bf16.mxu0 %v4686_v15 }
 0x3a7   :  { %v6202_v20 = vpack.c.bf16 %v6639_v5, %v6640_v16  ;;  %v6217_v5 = vpack.c.bf16 %v2267_v29, %v2264_v50  ;;  %v2270_v16 = vand.u32 4294901760, %v6204_v34 }
 0x3a9   :  { %4689 = vmatpush3.bf16.msra.mxu0 %v4686_v15  ;;  %4815 = vmatprep.subr.bf16.mxu1 %v6202_v20  ;;  %v2273_v15 = vand.u32 4294901760, %v6206_v3 }
 0x3aa   :  { %4691 = vmatprep.subr.bf16.mxu0 %v4690_v61  ;;  %4817 = vmatpush3.bf16.msra.mxu1 %v6202_v20 }
 0x3ab   :  { %4819 = vmatprep.subr.bf16.mxu1 %v6217_v5  ;;  %v6227_v49 = vpack.c.bf16 %v2273_v15, %v2270_v16 }
 0x3ad   :  { %4693 = vmatpush3.bf16.msra.mxu0 %v4690_v61 }
 0x3ae   :  { %4695 = vmatprep.subr.bf16.mxu0 %v4694_v25  ;;  %4821 = vmatpush3.bf16.msra.mxu1 %v6217_v5 }
 0x3af   :  { %4823 = vmatprep.subr.bf16.mxu1 %v6227_v49 }
 0x3b1   :  { %4697 = vmatpush3.bf16.msra.mxu0 %v4694_v25 }
 0x3b2   :  { %4699 = vmatprep.subr.bf16.mxu0 %v6067_v44  ;;  %4825 = vmatpush3.bf16.msra.mxu1 %v6227_v49 }
 0x3b5   :  { %4701 = vmatpush3.bf16.msra.mxu0 %v6067_v44  ;;  %v4746_v44 = vpack.c.bf16 %v1653_v17, %v1646_v13  ;;  %v4762_v13 = vpack.c.bf16 %v1709_v10, %v1702_v6  ;;  %v6655_v17 = vand.u32 4294901760, %v6019_v63  ;;  %v4774_v6 = vpack.c.bf16 %v6659_v30, %v6658_v59 }
 0x3b6   :  { %4703 = vmatprep.subr.bf16.mxu0 %v6071_v51  ;;  %v2285_v63 = vand.u32 4294901760, %v2239_v46 }
 0x3b9   :  { %4705 = vmatpush3.bf16.msra.mxu0 %v6071_v51  ;;  %v4750_v51 = vpack.c.bf16 %v1667_v39, %v1660_v23  ;;  %v6660_v23 = vand.u32 4294901760, %v6172_v14 }
 0x3ba   :  { %4707 = vmatprep.subr.bf16.mxu0 %v6075_v32 }
 0x3bb   :  { %v6331_v39 = vsub.f32 %v6172_v14, %v6660_v23 }
 0x3bd   :  { %4709 = vmatpush3.bf16.msra.mxu0 %v6075_v32  ;;  %v4766_v32 = vpack.c.bf16 %v6655_v17, %v1716_v57  ;;  %v2240_v57 = vld [vmem:[#allocation10 + $0x60] sm:$0xff] }
 0x3be   :  { %4711 = vmatprep.subr.bf16.mxu0 %v6079_v36 }
 0x3c1   :  { %4713 = vmatpush3.bf16.msra.mxu0 %v6079_v36  ;;  %v6656_v36 = vand.u32 4294901760, %v6031_v38  ;;  %v2288_v38 = vand.u32 4294901760, %v2240_v57 }
 0x3c2   :  { %4715 = vmatprep.subr.bf16.mxu0 %v5849_v42 }
 0x3c3   :  { %v4770_v8 = vpack.c.bf16 %v6657_v7, %v6656_v36  ;;  %v6376_v7 = vsub.f32 %v2240_v57, %v2288_v38 }
 0x3c4   :  { %3917 = vmatmul.mubr.f32.vlgmr.msra.gmra.mrb[2].mxu0 %v6118_v53  ;;  %v2362_v53 = vand.u32 4294901760, %v6331_v39 }
 0x3c5   :  { %4717 = vmatpush3.bf16.msra.mxu0 %v5849_v42  ;;  %3951 = vmatprep.mubr.f32.mxu0 %v1625_v62 }
 0x3c6   :  { %4719 = vmatprep.subr.bf16.mxu0 %v5857_v28  ;;  %v2363_v26 = vsub.f32 %v6331_v39, %v2362_v53 }
 0x3c9   :  { %4721 = vmatpush3.bf16.msra.mxu0 %v5857_v28 }
 0x3ca   :  { %4723 = vmatprep.subr.bf16.mxu0 %v5872_v58 }
 0x3cd   :  { %4725 = vmatpush3.bf16.msra.mxu0 %v5872_v58 }
 0x3ce   :  { %4727 = vmatprep.subr.bf16.mxu0 %v5884_v24 }
 0x3d1   :  { %4729 = vmatpush3.bf16.msra.mxu0 %v5884_v24 }
 0x3d2   :  { %4731 = vmatprep.subr.bf16.mxu0 %v5968_v48 }
 0x3d5   :  { %4733 = vmatpush3.bf16.msra.mxu0 %v5968_v48 }
 0x3d6   :  { %4735 = vmatprep.subr.bf16.mxu0 %v5972_v56 }
 0x3d9   :  { %4737 = vmatpush3.bf16.msra.mxu0 %v5972_v56 }
 0x3da   :  { %4739 = vmatprep.subr.bf16.mxu0 %v5976_v55 }
 0x3dd   :  { %4741 = vmatpush3.bf16.msra.mxu0 %v5976_v55 }
 0x3de   :  { %4743 = vmatprep.subr.bf16.mxu0 %v5992_v18 }
 0x3e1   :  { %4745 = vmatpush3.bf16.msra.mxu0 %v5992_v18 }
 0x3e2   :  { %4747 = vmatprep.subr.bf16.mxu0 %v4746_v44 }
 0x3e4   :  { %3952 = vmatmul.mubr.f32.vlgmr.msra.gmra.mrb[2].mxu0 %v1635_v37  ;;  %v2364_v37 = vand.u32 4294901760, %v2363_v26 }
 0x3e5   :  { %4749 = vmatpush3.bf16.msra.mxu0 %v4746_v44  ;;  %3986 = vmatprep.mubr.f32.mxu0 %v6108_v22  ;;  %v6364_v44 = vsub.f32 %v2239_v46, %v2285_v63 }
 0x3e6   :  { %4751 = vmatprep.subr.bf16.mxu0 %v4750_v51  ;;  %v6347_v62 = vpack.c.bf16 %v2364_v37, %v2357_v40 }
 0x3e9   :  { %4753 = vmatpush3.bf16.msra.mxu0 %v4750_v51 }
 0x3ea   :  { %4755 = vmatprep.subr.bf16.mxu0 %v4754_v11 }
 0x3ed   :  { %4757 = vmatpush3.bf16.msra.mxu0 %v4754_v11 }
 0x3ee   :  { %4759 = vmatprep.subr.bf16.mxu0 %v4758_v41 }
 0x3f1   :  { %4761 = vmatpush3.bf16.msra.mxu0 %v4758_v41 }
 0x3f2   :  { %4763 = vmatprep.subr.bf16.mxu0 %v4762_v13 }
 0x3f5   :  { %4765 = vmatpush3.bf16.msra.mxu0 %v4762_v13  ;;  %v6646_v13 = vand.u32 4294901760, %v6364_v44 }
 0x3f6   :  { %4767 = vmatprep.subr.bf16.mxu0 %v4766_v32 }
 0x3f7   :  { %v2433_v36 = vsub.f32 %v6364_v44, %v6646_v13 }
 0x3f9   :  { %4769 = vmatpush3.bf16.msra.mxu0 %v4766_v32  ;;  %v2434_v30 = vand.u32 4294901760, %v2433_v36 }
 0x3fa   :  { %4771 = vmatprep.subr.bf16.mxu0 %v4770_v8 }
 0x3fd   :  { %4773 = vmatpush3.bf16.msra.mxu0 %v4770_v8 }
 0x3fe   :  { %4775 = vmatprep.subr.bf16.mxu0 %v4774_v6 }
 0x401   :  { %4777 = vmatpush3.bf16.msra.mxu0 %v4774_v6  ;;  %v6645_v6 = vand.u32 4294901760, %v6376_v7 }
 0x402   :  { %4779 = vmatprep.subr.bf16.mxu0 %v5849_v42 }
 0x404   :  { %3987 = vmatmul.mubr.f32.vlgmr.msra.gmra.mrb[2].mxu0 %v6106_v2 }
 0x405   :  { %4781 = vmatpush3.bf16.msra.mxu0 %v5849_v42  ;;  %4021 = vmatprep.mubr.f32.mxu0 %v6108_v22  ;;  %v2297_v22 = vand.u32 4294901760, %v2243_v33 }
 0x406   :  { %4783 = vmatprep.subr.bf16.mxu0 %v5857_v28 }
 0x409   :  { %4785 = vmatpush3.bf16.msra.mxu0 %v5857_v28 }
 0x40a   :  { %4787 = vmatprep.subr.bf16.mxu0 %v5872_v58 }
 0x40d   :  { %4789 = vmatpush3.bf16.msra.mxu0 %v5872_v58  ;;  %v2236_v58 = vld [vmem:[#allocation10 + $0x40] sm:$0xff] }
 0x40e   :  { %4791 = vmatprep.subr.bf16.mxu0 %v5884_v24  ;;  %v2276_v42 = vand.u32 4294901760, %v2236_v58 }
 0x410   :  { %v6350_v19 = vsub.f32 %v2236_v58, %v2276_v42 }
 0x411   :  { %4793 = vmatpush3.bf16.msra.mxu0 %v5884_v24  ;;  %v2237_v24 = vld [vmem:[#allocation10 + $0x48] sm:$0xff] }
 0x412   :  { %4795 = vmatprep.subr.bf16.mxu0 %v5968_v48  ;;  %v2279_v28 = vand.u32 4294901760, %v2237_v24  ;;  %v2411_v9 = vand.u32 4294901760, %v6350_v19 }
 0x414   :  { %v6313_v10 = vpack.c.bf16 %v2279_v28, %v2276_v42  ;;  %v6352_v12 = vsub.f32 %v2237_v24, %v2279_v28  ;;  %v2412_v43 = vsub.f32 %v6350_v19, %v2411_v9  ;;  %v2440_v42 = vsub.f32 %v6376_v7, %v6645_v6 }
 0x415   :  { %4797 = vmatpush3.bf16.msra.mxu0 %v5968_v48  ;;  %v2238_v48 = vld [vmem:[#allocation10 + $0x50] sm:$0xff] }
 0x416   :  { %4799 = vmatprep.subr.bf16.mxu0 %v5972_v56  ;;  %4827 = vmatprep.subr.bf16.mxu1 %v6313_v10  ;;  %v2418_v14 = vand.u32 4294901760, %v6352_v12  ;;  %v2413_v51 = vand.u32 4294901760, %v2412_v43  ;;  %v6412_v54 = vpack.c.bf16 %v6352_v12, %v6350_v19  ;;  %v2960_v43 = vld [vmem:[%s6622_s6] ss:$0 sm:$0xff] }
 0x417   :  { %4829 = vmatpush3.bf16.msra.mxu1 %v6313_v10 }
 0x418   :  { %v2419_v61 = vsub.f32 %v6352_v12, %v2418_v14 }
 0x419   :  { %4801 = vmatpush3.bf16.msra.mxu0 %v5972_v56  ;;  %v2282_v56 = vand.u32 4294901760, %v2238_v48 }
 0x41a   :  { %4803 = vmatprep.subr.bf16.mxu0 %v5976_v55  ;;  %v2420_v11 = vand.u32 4294901760, %v2419_v61  ;;  %v6661_v61 = vand.u32 4294901760, %v6174_v21 }
 0x41b   :  { %v6362_v25 = vsub.f32 %v2238_v48, %v2282_v56  ;;  %v6389_v48 = vsub.f32 %v2243_v33, %v2297_v22 }
 0x41c   :  { %v6368_v17 = vpack.c.bf16 %v2420_v11, %v2413_v51  ;;  %v6432_v51 = vsub.f32 %v6174_v21, %v6661_v61  ;;  %v6662_v11 = vand.u32 4294901760, %v6180_v31  ;;  %v6474_v61 = vsub.f32 %v6206_v3, %v2273_v15 }
 0x41d   :  { %4805 = vmatpush3.bf16.msra.mxu0 %v5976_v55  ;;  %v6317_v55 = vpack.c.bf16 %v2285_v63, %v2282_v56  ;;  %v2425_v41 = vand.u32 4294901760, %v6362_v25  ;;  %v2441_v56 = vand.u32 4294901760, %v2440_v42  ;;  %v6642_v57 = vand.u32 4294901760, %v6389_v48 }
 0x41e   :  { %4807 = vmatprep.subr.bf16.mxu0 %v5992_v18  ;;  %v6416_v26 = vpack.c.bf16 %v6364_v44, %v6362_v25  ;;  %v2404_v15 = vand.u32 4294901760, %v6474_v61  ;;  %v6667_v12 = vand.u32 4294901760, %v6389_v48 }
 0x41f   :  { %4831 = vmatprep.subr.bf16.mxu1 %v6317_v55  ;;  %v2426_v32 = vsub.f32 %v6362_v25, %v2425_v41 }
 0x420   :  { %4833 = vmatpush3.bf16.msra.mxu1 %v6317_v55  ;;  %v2405_v13 = vsub.f32 %v6474_v61, %v2404_v15 }
 0x421   :  { %4809 = vmatpush3.bf16.msra.mxu0 %v5992_v18  ;;  %v2241_v18 = vld [vmem:[#allocation10 + $0x68] sm:$0xff]  ;;  %v2427_v59 = vand.u32 4294901760, %v2426_v32  ;;  %v6437_v32 = vsub.f32 %v6180_v31, %v6662_v11 }
 0x422   :  { %v2291_v45 = vand.u32 4294901760, %v2241_v18 }
 0x423   :  { %v6382_v24 = vpack.c.bf16 %v2434_v30, %v2427_v59 }
 0x424   :  { %4022 = vmatmul.mubr.f32.vlgmr.msra.gmra.mrb[2].mxu0 %v6106_v2  ;;  %v6321_v4 = vpack.c.bf16 %v2291_v45, %v2288_v38  ;;  %v2294_v2 = vand.u32 4294901760, %v2242_v0  ;;  %v6378_v8 = vsub.f32 %v2241_v18, %v2291_v45  ;;  %v2461_v45 = vsub.f32 %v6389_v48, %v6642_v57 }
 0x426   :  { %4835 = vmatprep.subr.bf16.mxu1 %v6321_v4  ;;  %v6337_v60 = vpack.c.bf16 %v2297_v22, %v2294_v2  ;;  %v6644_v58 = vand.u32 4294901760, %v6378_v8  ;;  %v6387_v28 = vsub.f32 %v2242_v0, %v2294_v2  ;;  %v2462_v33 = vand.u32 4294901760, %v2461_v45 }
 0x427   :  { %4837 = vmatpush3.bf16.msra.mxu1 %v6321_v4  ;;  %v6408_v22 = vpack.c.bf16 %v6331_v39, %v6326_v52  ;;  %v6420_v40 = vpack.c.bf16 %v6378_v8, %v6376_v7 }
 0x428   :  { %4839 = vmatprep.subr.bf16.mxu1 %v6337_v60  ;;  %v2447_v46 = vsub.f32 %v6378_v8, %v6644_v58  ;;  %v6643_v63 = vand.u32 4294901760, %v6387_v28  ;;  %v6424_v37 = vpack.c.bf16 %v6389_v48, %v6387_v28  ;;  %v6666_v19 = vand.u32 4294901760, %v6387_v28 }
 0x42a   :  { %v2448_v18 = vand.u32 4294901760, %v2447_v46  ;;  %v2454_v38 = vsub.f32 %v6387_v28, %v6643_v63  ;;  %v2369_v46 = vand.u32 4294901760, %v6432_v51 }
 0x42b   :  { %4841 = vmatpush3.bf16.msra.mxu1 %v6337_v60 }
 0x42c   :  { %4843 = vmatprep.subr.bf16.mxu1 %v6347_v62  ;;  %v6402_v23 = vpack.c.bf16 %v2448_v18, %v2441_v56  ;;  %v2455_v0 = vand.u32 4294901760, %v2454_v38  ;;  %v2376_v56 = vand.u32 4294901760, %v6437_v32  ;;  %v6444_v18 = vsub.f32 %v6183_v35, %v2264_v50 }
 0x42d   :  { %v6449_v38 = vsub.f32 %v6185_v27, %v2267_v29  ;;  %v6469_v29 = vsub.f32 %v6204_v34, %v2270_v16 }
 0x42e   :  { %v6404_v2 = vpack.c.bf16 %v2462_v33, %v2455_v0  ;;  %v2370_v33 = vsub.f32 %v6432_v51, %v2369_v46  ;;  %v2377_v35 = vsub.f32 %v6437_v32, %v2376_v56  ;;  %v2383_v50 = vand.u32 4294901760, %v6444_v18 }
 0x42f   :  { %v2390_v27 = vand.u32 4294901760, %v6449_v38  ;;  %v2397_v3 = vand.u32 4294901760, %v6469_v29 }
 0x431   :  { %v2391_v34 = vsub.f32 %v6449_v38, %v2390_v27  ;;  %v2398_v6 = vsub.f32 %v6469_v29, %v2397_v3  ;;  %v4946_v52 = vpack.c.bf16 %v2390_v27, %v2383_v50  ;;  %v4950_v39 = vpack.c.bf16 %v2404_v15, %v2397_v3 }
 0x433   :  { %v2392_v58 = vand.u32 4294901760, %v2391_v34 }
 0x4f7   :  { %v4023_v36 = vpop.f32.mrb[2].mxu0 }
 0x4f8   :  { %v5006_v59 = vadd.f32 %v4023_v36, %v2960_v43  ;;  %v2216_v30 = vpop.f32.mrb[3].mxu0 }
 0x4f9   :  { %v5007_v42 = vadd.f32 %v2960_v43, %v2216_v30  ;;  %v2371_v30 = vand.u32 4294901760, %v2370_v33 }
 0x4fa   :  { %v2227_v21 = vmax.f32 %v5006_v59, 0.0 }
 0x4fb   :  { %v2226_v31 = vmax.f32 %v5007_v42, 0.0  ;;  %v2378_v42 = vand.u32 4294901760, %v2377_v35 }
 0x4fc   :  { %v6451_v45 = vand.u32 4294901760, %v2227_v21 }
 0x4fd   :  { %v6453_v0 = vand.u32 4294901760, %v2226_v31  ;;  %v4846_v35 = vpack.c.bf16 %v2378_v42, %v2371_v30  ;;  %v2399_v30 = vand.u32 4294901760, %v2398_v6  ;;  %v2406_v42 = vand.u32 4294901760, %v2405_v13 }
 0x4fe   :  { %v6463_v43 = vsub.f32 %v2227_v21, %v6451_v45  ;;  %v2384_v21 = vsub.f32 %v6444_v18, %v2383_v50  ;;  %v4882_v13 = vpack.c.bf16 %v6449_v38, %v6444_v18  ;;  %v4938_v6 = vpack.c.bf16 %v2362_v53, %v2355_v47 }
 0x4ff   :  { %v6477_v11 = vsub.f32 %v2226_v31, %v6453_v0  ;;  %v4954_v47 = vpack.c.bf16 %v2418_v14, %v2411_v9  ;;  %v6663_v53 = vand.u32 4294901760, %v6364_v44  ;;  %v4966_v9 = vpack.c.bf16 %v6667_v12, %v6666_v19 }
 0x500   :  { %v2344_v36 = vand.u32 4294901760, %v6463_v43  ;;  %v2385_v57 = vand.u32 4294901760, %v2384_v21  ;;  %v4854_v21 = vpack.c.bf16 %v2406_v42, %v2399_v30 }
 0x501   :  { %v2334_v59 = vand.u32 4294901760, %v6477_v11 }
 0x502   :  { %v2345_v16 = vsub.f32 %v6463_v43, %v2344_v36 }
 0x503   :  { %v2335_v31 = vsub.f32 %v6477_v11, %v2334_v59 }
 0x504   :  { %v2346_v63 = vand.u32 4294901760, %v2345_v16 }
 0x505   :  { %v2336_v33 = vand.u32 4294901760, %v2335_v31  ;;  %v4850_v31 = vpack.c.bf16 %v2392_v58, %v2385_v57  ;;  %v4942_v58 = vpack.c.bf16 %v2376_v56, %v2369_v46  ;;  %v6665_v57 = vand.u32 4294901760, %v6378_v8 }
 0x507   :  { %4056 = vmatprep.mubr.f32.mxu1 %v2336_v33 }
 0x508   :  { %4057 = vmatmul.mubr.f32.vlgmr.msra.gmra.mrb[2].mxu1 %v2346_v63  ;;  %v6664_v63 = vand.u32 4294901760, %v6376_v7 }
 0x509   :  { %4845 = vmatpush3.bf16.msra.mxu1 %v6347_v62  ;;  %4091 = vmatprep.mubr.f32.mxu1 %v6453_v0  ;;  %v4878_v62 = vpack.c.bf16 %v6437_v32, %v6432_v51 }
 0x50a   :  { %4847 = vmatprep.subr.bf16.mxu1 %v4846_v35 }
 0x50d   :  { %4849 = vmatpush3.bf16.msra.mxu1 %v4846_v35 }
 0x50e   :  { %4851 = vmatprep.subr.bf16.mxu1 %v4850_v31 }
 0x511   :  { %4853 = vmatpush3.bf16.msra.mxu1 %v4850_v31 }
 0x512   :  { %4855 = vmatprep.subr.bf16.mxu1 %v4854_v21 }
 0x515   :  { %4857 = vmatpush3.bf16.msra.mxu1 %v4854_v21 }
 0x516   :  { %4859 = vmatprep.subr.bf16.mxu1 %v6368_v17 }
 0x519   :  { %4861 = vmatpush3.bf16.msra.mxu1 %v6368_v17  ;;  %v4886_v17 = vpack.c.bf16 %v6474_v61, %v6469_v29 }
 0x51a   :  { %4863 = vmatprep.subr.bf16.mxu1 %v6382_v24 }
 0x51d   :  { %4865 = vmatpush3.bf16.msra.mxu1 %v6382_v24  ;;  %v4958_v24 = vpack.c.bf16 %v6663_v53, %v2425_v41 }
 0x51e   :  { %4867 = vmatprep.subr.bf16.mxu1 %v6402_v23 }
 0x521   :  { %4869 = vmatpush3.bf16.msra.mxu1 %v6402_v23  ;;  %v4962_v23 = vpack.c.bf16 %v6665_v57, %v6664_v63 }
 0x522   :  { %4871 = vmatprep.subr.bf16.mxu1 %v6404_v2 }
 0x525   :  { %4873 = vmatpush3.bf16.msra.mxu1 %v6404_v2 }
 0x526   :  { %4875 = vmatprep.subr.bf16.mxu1 %v6408_v22 }
 0x528   :  { %4092 = vmatmul.mubr.f32.vlgmr.msra.gmra.mrb[2].mxu1 %v6451_v45 }
 0x529   :  { %4877 = vmatpush3.bf16.msra.mxu1 %v6408_v22  ;;  %4126 = vmatprep.mubr.f32.mxu1 %v6477_v11 }
 0x52a   :  { %4879 = vmatprep.subr.bf16.mxu1 %v4878_v62 }
 0x52d   :  { %4881 = vmatpush3.bf16.msra.mxu1 %v4878_v62 }
 0x52e   :  { %4883 = vmatprep.subr.bf16.mxu1 %v4882_v13 }
 0x531   :  { %4885 = vmatpush3.bf16.msra.mxu1 %v4882_v13 }
 0x532   :  { %4887 = vmatprep.subr.bf16.mxu1 %v4886_v17 }
 0x535   :  { %4889 = vmatpush3.bf16.msra.mxu1 %v4886_v17 }
 0x536   :  { %4891 = vmatprep.subr.bf16.mxu1 %v6412_v54 }
 0x539   :  { %4893 = vmatpush3.bf16.msra.mxu1 %v6412_v54 }
 0x53a   :  { %4895 = vmatprep.subr.bf16.mxu1 %v6416_v26 }
 0x53d   :  { %4897 = vmatpush3.bf16.msra.mxu1 %v6416_v26 }
 0x53e   :  { %4899 = vmatprep.subr.bf16.mxu1 %v6420_v40 }
 0x541   :  { %4901 = vmatpush3.bf16.msra.mxu1 %v6420_v40 }
 0x542   :  { %4903 = vmatprep.subr.bf16.mxu1 %v6424_v37 }
 0x545   :  { %4905 = vmatpush3.bf16.msra.mxu1 %v6424_v37 }
 0x546   :  { %4907 = vmatprep.subr.bf16.mxu1 %v6194_v1 }
 0x548   :  { %4127 = vmatmul.mubr.f32.vlgmr.msra.gmra.mrb[2].mxu1 %v6463_v43 }
 0x549   :  { %4909 = vmatpush3.bf16.msra.mxu1 %v6194_v1  ;;  %4161 = vmatprep.mubr.f32.mxu1 %v2334_v59 }
 0x54a   :  { %4911 = vmatprep.subr.bf16.mxu1 %v6202_v20 }
 0x54d   :  { %4913 = vmatpush3.bf16.msra.mxu1 %v6202_v20 }
 0x54e   :  { %4915 = vmatprep.subr.bf16.mxu1 %v6217_v5 }
 0x551   :  { %4917 = vmatpush3.bf16.msra.mxu1 %v6217_v5 }
 0x552   :  { %4919 = vmatprep.subr.bf16.mxu1 %v6227_v49 }
 0x555   :  { %4921 = vmatpush3.bf16.msra.mxu1 %v6227_v49 }
 0x556   :  { %4923 = vmatprep.subr.bf16.mxu1 %v6313_v10 }
 0x559   :  { %4925 = vmatpush3.bf16.msra.mxu1 %v6313_v10 }
 0x55a   :  { %4927 = vmatprep.subr.bf16.mxu1 %v6317_v55 }
 0x55d   :  { %4929 = vmatpush3.bf16.msra.mxu1 %v6317_v55 }
 0x55e   :  { %4931 = vmatprep.subr.bf16.mxu1 %v6321_v4 }
 0x561   :  { %4933 = vmatpush3.bf16.msra.mxu1 %v6321_v4 }
 0x562   :  { %4935 = vmatprep.subr.bf16.mxu1 %v6337_v60 }
 0x565   :  { %4937 = vmatpush3.bf16.msra.mxu1 %v6337_v60 }
 0x566   :  { %4939 = vmatprep.subr.bf16.mxu1 %v4938_v6 }
 0x568   :  { %4162 = vmatmul.mubr.f32.vlgmr.msra.gmra.mrb[2].mxu1 %v2344_v36 }
 0x569   :  { %4941 = vmatpush3.bf16.msra.mxu1 %v4938_v6  ;;  %4196 = vmatprep.mubr.f32.mxu1 %v6453_v0 }
 0x56a   :  { %4943 = vmatprep.subr.bf16.mxu1 %v4942_v58 }
 0x56d   :  { %4945 = vmatpush3.bf16.msra.mxu1 %v4942_v58 }
 0x56e   :  { %4947 = vmatprep.subr.bf16.mxu1 %v4946_v52 }
 0x571   :  { %4949 = vmatpush3.bf16.msra.mxu1 %v4946_v52 }
 0x572   :  { %4951 = vmatprep.subr.bf16.mxu1 %v4950_v39 }
 0x575   :  { %4953 = vmatpush3.bf16.msra.mxu1 %v4950_v39 }
 0x576   :  { %4955 = vmatprep.subr.bf16.mxu1 %v4954_v47 }
 0x579   :  { %4957 = vmatpush3.bf16.msra.mxu1 %v4954_v47 }
 0x57a   :  { %4959 = vmatprep.subr.bf16.mxu1 %v4958_v24 }
 0x57d   :  { %4961 = vmatpush3.bf16.msra.mxu1 %v4958_v24 }
 0x57e   :  { %4963 = vmatprep.subr.bf16.mxu1 %v4962_v23 }
 0x581   :  { %4965 = vmatpush3.bf16.msra.mxu1 %v4962_v23 }
 0x582   :  { %4967 = vmatprep.subr.bf16.mxu1 %v4966_v9 }
 0x585   :  { %4969 = vmatpush3.bf16.msra.mxu1 %v4966_v9 }
 0x586   :  { %4971 = vmatprep.subr.bf16.mxu1 %v6194_v1 }
 0x588   :  { %4197 = vmatmul.mubr.f32.vlgmr.msra.gmra.mrb[2].mxu1 %v6451_v45 }
 0x589   :  { %4973 = vmatpush3.bf16.msra.mxu1 %v6194_v1  ;;  %4231 = vmatprep.mubr.f32.mxu1 %v6453_v0 }
 0x58a   :  { %4975 = vmatprep.subr.bf16.mxu1 %v6202_v20 }
 0x58d   :  { %4977 = vmatpush3.bf16.msra.mxu1 %v6202_v20 }
 0x58e   :  { %4979 = vmatprep.subr.bf16.mxu1 %v6217_v5 }
 0x591   :  { %4981 = vmatpush3.bf16.msra.mxu1 %v6217_v5 }
 0x592   :  { %4983 = vmatprep.subr.bf16.mxu1 %v6227_v49 }
 0x595   :  { %4985 = vmatpush3.bf16.msra.mxu1 %v6227_v49  ;;  %v2961_v49 = vld [vmem:[%s6624_s8] ss:$0 sm:$0xff] }
 0x596   :  { %4987 = vmatprep.subr.bf16.mxu1 %v6313_v10 }
 0x599   :  { %4989 = vmatpush3.bf16.msra.mxu1 %v6313_v10 }
 0x59a   :  { %4991 = vmatprep.subr.bf16.mxu1 %v6317_v55 }
 0x59d   :  { %4993 = vmatpush3.bf16.msra.mxu1 %v6317_v55 }
 0x59e   :  { %4995 = vmatprep.subr.bf16.mxu1 %v6321_v4 }
 0x5a1   :  { %4997 = vmatpush3.bf16.msra.mxu1 %v6321_v4 }
 0x5a2   :  { %4999 = vmatprep.subr.bf16.mxu1 %v6337_v60 }
 0x5a5   :  { %5001 = vmatpush3.bf16.msra.mxu1 %v6337_v60 }
 0x5a8   :  { %4232 = vmatmul.mubr.f32.vlgmr.msra.gmra.mrb[2].mxu1 %v6451_v45 }
 0x67b   :  { %v4233_v5 = vpop.f32.mrb[2].mxu1 }
 0x67c   :  { %v5008_v1 = vadd.f32 %v4233_v5, %v2961_v49  ;;  %v2925_v20 = vpop.f32.mrb[3].mxu1 }
 0x67d   :  { %v5009_v10 = vadd.f32 %v2961_v49, %v2925_v20 }
 0x67e   :  { %v2936_v55 = vmax.f32 %v5008_v1, 0.0 }
 0x67f   :  { %v2935_v14 = vmax.f32 %v5009_v10, 0.0 }
 0x680   :  { %2938 = vst [vmem:[#allocation11 + $0x8] sm:$0xff] %v2936_v55 }
 0x681   :  { %2937 = vst [vmem:[#allocation11] sm:$0xff] %v2935_v14 }
 0x682   :  { %5179 = shalt.err (!%p5176_p2)
}
 0x683   :  { %s5180_s14 = scalar_lea.hbm %s6625_s9, 256 }
 0x684   :  { %p5181_p3 = scmp.ne.s32.totalorder %s6625_s9, %s5180_s14  ;;  %p5184_p4 = scmp.lt.u32.totalorder %s5180_s14, %s6625_s9 }
 0x686   :  { %p5186_p5 = pnand %p5184_p4, %p5181_p3 }
 0x688   :  { %5189 = shalt.err (!%p5186_p5)
}
 0x689   :  { %2950 = dma.vmem_to_hbm [thread:$0]  %s2945_s13, 256, %s6625_s9, [#allocation4], %s5200_s21, %s5200_s21, %s5201_s22  }
 0x68a   :  { %5196 = dma.done.wait [#allocation4], 256  }
 0x68b   :  { %5197 = vsyncadd [#allocation4], 4294967040 }
 0x68c   :  { %2954 = vsyncpa [#allocation3], 1 }
 0x68d   :  { %2955 = vsyncpa [#allocation6], 1 }
 0x68e   :  { %2956 = vsyncpa [#allocation9], 1 }
 0x68f   :  { %2957 = vsyncpa [#allocation4], 1 }

</bundles_post_ra>
